<compile_context>
chip_gen: v7x
topology: tpu7x:2x2x1
jax: 0.10.0
libtpu: 0.0.40
codegen_flags: <defaults>
</compile_context>

<pallas_src>
import functools

import jax
import jax.numpy as jnp
import numpy as np
from jax import lax
from jax.experimental import pallas as pl
from jax.experimental.pallas import tpu as pltpu


# ---------------------------------------------------------------------------
# Pallas kernel
# ---------------------------------------------------------------------------
def _autoenc(h, w1_ref, b1_ref, w2_ref, b2_ref, w3_ref, b3_ref,
             mxu_dtype=jnp.float32):
    """Linear->BN->ReLU, Linear->BN->ReLU, Linear->BN (BN folded into W/b).

    MXU operands are cast to `mxu_dtype`; accumulation, biases and ReLU stay
    in f32 (keeps v5e's f32-only VPU happy and the numerics tight).
    """
    def mm(a, w_ref):
        return jnp.dot(a.astype(mxu_dtype), w_ref[...].astype(mxu_dtype),
                       preferred_element_type=jnp.float32)

    z = mm(h, w1_ref) + b1_ref[...]
    z = jnp.maximum(z, 0.0)
    z = mm(z, w2_ref) + b2_ref[...]
    z = jnp.maximum(z, 0.0)
    z = mm(z, w3_ref) + b3_ref[...]
    return z


def forecast_kernel(max_gap,                      # static python int (closure)
                    gap_ref, x_ref,
                    wcat_ref, brnn_ref,
                    w1_ref, b1_ref, w2_ref, b2_ref, w3_ref, b3_ref,
                    xpred_ref, y_ref):
    TB, Fp = x_ref.shape                          # x is time-major flat (T*Bp, Fp)
    Bp = gap_ref.shape[0]
    T = TB // Bp

    brnn = brnn_ref[...]                          # (1, Fp): one vreg, hoisted

    # ---- 1. Batched input projection for all observed timesteps (one matmul,
    #         off the serial path).  W_ih is the top half of the fused weight.
    pre = jnp.dot(x_ref[...], wcat_ref[:Fp, :],
                  preferred_element_type=jnp.float32) + brnn        # (T*Bp, Fp)

    # ---- 2. Serial Elman recurrence (h0 = 0); only the recurrence is serial.
    #         Fully unrolled; per-step hidden states kept in vregs (no VMEM
    #         scratch round-trip).  Slices of `pre` are 8-sublane aligned.
    # TODO(synk): hold the recurrent RHS resident in MXU weight registers
    #             (pltpu.matmul_push_rhs / matmul_acc_lhs / matmul_pop).
    h = jnp.zeros((Bp, Fp), jnp.float32)
    hs = []
    for i in range(T):
        h = jnp.tanh(pre[i * Bp:(i + 1) * Bp, :]
                     + jnp.dot(h, wcat_ref[Fp:, :],
                               preferred_element_type=jnp.float32))
        hs.append(h)
    h_all = jnp.concatenate(hs, axis=0)           # (T*Bp, Fp), tile-aligned

    # ---- 3. Batched autoencoder over all T*Bp rows (FLOP bulk): bf16 MXU
    #         inputs, f32 accumulation; lane-dense (...,128) output store.
    y_flat = _autoenc(h_all, w1_ref, b1_ref, w2_ref, b2_ref, w3_ref, b3_ref,
                      mxu_dtype=jnp.bfloat16)
    y_ref[...] = y_flat                           # (T*Bp, Fp), unmasked vst

    # ---- 4. Autoregressive rollout of max_gap steps, per-row gap selection.
    #         One fused MXU dot per step on concat([x_hat, h_hat]); the gap
    #         broadcast is hoisted out of the body; x_pred is carried in
    #         vregs and stored once.
    gap_m1 = jnp.broadcast_to(gap_ref[...] - 1, (Bp, Fp))            # int32
    x_hat0 = y_flat[(T - 1) * Bp:, :]             # y[:, -1, :]
    h_hat0 = h                                    # h[:, -1, :]

    def roll_body(t_pred, carry):
        h_hat, x_hat, x_pred = carry
        xh = jnp.concatenate([x_hat, h_hat], axis=-1)                # (Bp, 2Fp)
        h_new = jnp.tanh(jnp.dot(xh, wcat_ref[...],
                                 preferred_element_type=jnp.float32) + brnn)
        x_new = _autoenc(h_new, w1_ref, b1_ref, w2_ref, b2_ref, w3_ref, b3_ref)
        x_pred = jnp.where(gap_m1 == t_pred, x_new, x_pred)
        return (h_new, x_new, x_pred)

    x_pred = jnp.zeros((Bp, Fp), jnp.float32)
    if max_gap > 0:
        _, _, x_pred = lax.fori_loop(0, max_gap, roll_body,
                                     (h_hat0, x_hat0, x_pred), unroll=True)
    xpred_ref[...] = x_pred


# ---------------------------------------------------------------------------
# Wrapper (padding, BN folding into Linear, losses, pallas_call)
# ---------------------------------------------------------------------------
def _fold_bn(params, name, eps=1e-5):
    g = params[f"{name}_gamma"]
    b = params[f"{name}_beta"]
    m = params[f"{name}_mean"]
    v = params[f"{name}_var"]
    sc = g / jnp.sqrt(v + eps)
    sh = b - m * sc
    return sc, sh


def _pad_to(a, shape):
    """Zero-pad `a` up to `shape` (trailing pads only)."""
    return jnp.pad(a, [(0, s - d) for d, s in zip(a.shape, shape)])


def _round_up(n, m):
    return (n + m - 1) // m * m


@functools.partial(jax.jit, static_argnames=("max_gap",))
def forecast_rnn_forward(params, x, t, *, max_gap):
    """x: (B, T+1, F) batch-first float32; t: (B,) int32 gaps in [1, max_gap]."""
    B, Ttot, F = x.shape
    T = Ttot - 1
    H = params["w1"].shape[0]                     # autoencoder hidden (250)

    # Lane / sublane friendly padded sizes (vreg tile is (8, 128)).
    Fp = _round_up(max(F, 128), 128)              # 32  -> 128
    Hp = _round_up(max(H, 128), 128)              # 250 -> 256
    Bp = _round_up(B, 8)                          # 4   -> 8

    x = x.astype(jnp.float32)
    xs = x[:, :T, :]                              # observed steps (unpadded, for loss)
    x_final = x[:, T, :]

    # Clamp gaps to the static cap so t[b] > max_gap can't silently zero a
    # row's prediction.  Callers must choose max_gap >= t.max() for exact
    # reference semantics (the reference rolls out to t.max()).
    gap = jnp.clip(t.astype(jnp.int32), 1, max_gap).reshape(B, 1)
    gap = jnp.pad(gap, ((0, Bp - B), (0, 0)), constant_values=1)

    # Time-major flattened (T*Bp, Fp): row index = timestep * Bp + batch.
    xs_p = _pad_to(xs, (Bp, T, Fp))
    x_obs_flat = jnp.transpose(xs_p, (1, 0, 2)).reshape(T * Bp, Fp)

    # Fused [W_ih; W_hh] (2Fp, Fp) recurrent weight, zero-padded.
    wih = _pad_to(params["w_ih"].T, (Fp, Fp))
    whh = _pad_to(params["w_hh"].T, (Fp, Fp))
    w_cat = jnp.concatenate([wih, whh], axis=0)
    b_rnn = _pad_to((params["b_ih"] + params["b_hh"]).reshape(1, F), (1, Fp))

    # Fold eval-mode BatchNorm into the Linear layers (Linear->BN == Linear'),
    # then zero-pad; zero bias pads keep padded channels exactly zero.
    sc1, sh1 = _fold_bn(params, "bn1")
    sc2, sh2 = _fold_bn(params, "bn2")
    sc3, sh3 = _fold_bn(params, "bn3")
    w1 = _pad_to(params["w1"].T * sc1[None, :], (Fp, Hp))
    b1 = _pad_to((params["b1"] * sc1 + sh1).reshape(1, H), (1, Hp))
    w2 = _pad_to(params["w2"].T * sc2[None, :], (Hp, Hp))
    b2 = _pad_to((params["b2"] * sc2 + sh2).reshape(1, H), (1, Hp))
    w3 = _pad_to(params["w3"].T * sc3[None, :], (Hp, Fp))
    b3 = _pad_to((params["b3"] * sc3 + sh3).reshape(1, F), (1, Fp))

    inputs = (gap, x_obs_flat, w_cat, b_rnn, w1, b1, w2, b2, w3, b3)

    # Toy sizes: everything resident in VMEM, single program (no grid).
    vmem = pl.BlockSpec(memory_space=pltpu.MemorySpace.VMEM)
    out_shapes = (
        jax.ShapeDtypeStruct((Bp, Fp), jnp.float32),        # x_pred (padded)
        jax.ShapeDtypeStruct((T * Bp, Fp), jnp.float32),    # y (time-major flat)
    )

    kernel = functools.partial(forecast_kernel, max_gap)
    x_pred_p, y_flat_p = pl.pallas_call(
        kernel,
        out_shape=out_shapes,
        in_specs=[vmem] * len(inputs),
        out_specs=(vmem, vmem),
    )(*inputs)

    # Slice the padding back off before any reduction.
    y = jnp.transpose(y_flat_p.reshape(T, Bp, Fp)[:, :B, :F], (1, 0, 2))  # (B,T,F)
    x_pred = x_pred_p[:B, :F]

    # Losses: pure reductions off the serial path -> computed in XLA.
    # loss(a, b) = MSE_mean(a, b) / nelement(a) = sumsq / nelt^2.
    if T != 1:
        nelt1 = (T - 1) * B * F
        d1 = y[:, :-1, :] - xs[:, 1:, :]
        loss = jnp.sum(d1 * d1) / float(nelt1 * nelt1)
    else:
        loss = jnp.float32(0.0)
    nelt2 = B * F
    d2 = x_pred - x_final
    loss = loss + jnp.sum(d2 * d2) / float(nelt2 * nelt2)

    return x_pred, loss, y


# ---------------------------------------------------------------------------
# Pure-JAX reference (for correctness check)
# ---------------------------------------------------------------------------
def forecast_rnn_reference(params, x, t):
    B, Ttot, F = x.shape
    T = Ttot - 1
    eps = 1e-5

    def bn(z, name):
        g = params[f"{name}_gamma"]
        b = params[f"{name}_beta"]
        m = params[f"{name}_mean"]
        v = params[f"{name}_var"]
        return (z - m) / jnp.sqrt(v + eps) * g + b

    def autoenc(h):
        z = h @ params["w1"].T + params["b1"]
        z = jnp.maximum(bn(z, "bn1"), 0.0)
        z = z @ params["w2"].T + params["b2"]
        z = jnp.maximum(bn(z, "bn2"), 0.0)
        z = z @ params["w3"].T + params["b3"]
        return bn(z, "bn3")

    def rnn_step(h, xt):
        return jnp.tanh(xt @ params["w_ih"].T + params["b_ih"]
                        + h @ params["w_hh"].T + params["b_hh"])

    x_final = x[:, -1, :]
    xs = x[:, :-1, :]
    h = jnp.zeros((B, F), jnp.float32)
    hs = []
    for i in range(T):
        h = rnn_step(h, xs[:, i, :])
        hs.append(h)
    h_all = jnp.stack(hs, axis=1)
    y = autoenc(h_all.reshape(B * T, F)).reshape(B, T, F)

    if T != 1:
        nelt1 = (T - 1) * B * F
        loss = jnp.mean((y[:, :-1, :] - xs[:, 1:, :]) ** 2) / nelt1
    else:
        loss = jnp.float32(0.0)

    x_hat = y[:, -1, :]
    h_hat = h_all[:, -1, :]
    max_gap = int(jnp.max(t))
    preds = []
    for _ in range(max_gap):
        h_hat = rnn_step(h_hat, x_hat)
        x_hat = autoenc(h_hat)
        preds.append(x_hat)
    x_all = jnp.stack(preds, axis=1)
    x_pred = x_all[jnp.arange(B), t - 1, :]

    nelt2 = B * F
    loss = loss + jnp.mean((x_pred - x_final) ** 2) / nelt2
    return x_pred, loss, y


# ---------------------------------------------------------------------------
# Deterministic parameter init (shapes from forecastRNN.__init__)
# ---------------------------------------------------------------------------
def init_params(key, nfeat, hidden=250):
    ks = jax.random.split(key, 22)

    def unif(k, shape, scale):
        return jax.random.uniform(k, shape, jnp.float32, -scale, scale)

    kr = 1.0 / np.sqrt(nfeat)
    k1 = 1.0 / np.sqrt(nfeat)
    k2 = 1.0 / np.sqrt(hidden)
    p = {
        # nn.RNN(input=F, hidden=F, 1 layer, tanh)
        "w_ih": unif(ks[0], (nfeat, nfeat), kr),
        "w_hh": unif(ks[1], (nfeat, nfeat), kr),
        "b_ih": unif(ks[2], (nfeat,), kr),
        "b_hh": unif(ks[3], (nfeat,), kr),
        # autoenc: Linear(F,250) / Linear(250,250) / Linear(250,F)
        "w1": unif(ks[4], (hidden, nfeat), k1),
        "b1": unif(ks[5], (hidden,), k1),
        "w2": unif(ks[6], (hidden, hidden), k2),
        "b2": unif(ks[7], (hidden,), k2),
        "w3": unif(ks[8], (nfeat, hidden), k2),
        "b3": unif(ks[9], (nfeat,), k2),
        # BatchNorm1d params + running stats (eval mode)
        "bn1_gamma": jax.random.uniform(ks[10], (hidden,), jnp.float32, 0.5, 1.5),
        "bn1_beta": unif(ks[11], (hidden,), 0.1),
        "bn1_mean": unif(ks[12], (hidden,), 0.1),
        "bn1_var": jax.random.uniform(ks[13], (hidden,), jnp.float32, 0.5, 1.5),
        "bn2_gamma": jax.random.uniform(ks[14], (hidden,), jnp.float32, 0.5, 1.5),
        "bn2_beta": unif(ks[15], (hidden,), 0.1),
        "bn2_mean": unif(ks[16], (hidden,), 0.1),
        "bn2_var": jax.random.uniform(ks[17], (hidden,), jnp.float32, 0.5, 1.5),
        "bn3_gamma": jax.random.uniform(ks[18], (nfeat,), jnp.float32, 0.5, 1.5),
        "bn3_beta": unif(ks[19], (nfeat,), 0.1),
        "bn3_mean": unif(ks[20], (nfeat,), 0.1),
        "bn3_var": jax.random.uniform(ks[21], (nfeat,), jnp.float32, 0.5, 1.5),
    }
    return p


if __name__ == "__main__":
    key = jax.random.PRNGKey(0)
    B, T, F = 4, 8, 32                      # observed seq of T, plus x_final
    MAX_GAP = 4                             # static cap on the gap (no host sync)
    kx, kt, kp = jax.random.split(key, 3)

    x = jax.random.normal(kx, (B, T + 1, F), jnp.float32)
    t = jax.random.randint(kt, (B,), 1, MAX_GAP + 1).astype(jnp.int32)  # gaps in [1, 4]
    params = init_params(kp, F)

    x_pred, loss, y = forecast_rnn_forward(params, x, t, max_gap=MAX_GAP)
    jax.block_until_ready((x_pred, loss, y))

    # Correctness check against a pure-JAX f32 reference (eval-mode semantics).
    # Tolerances sized for the bf16-input / f32-accumulate autoencoder matmuls.
    xr, lr, yr = forecast_rnn_reference(params, x, t)
    np.testing.assert_allclose(np.asarray(y), np.asarray(yr), rtol=2e-2, atol=2e-2)
    np.testing.assert_allclose(np.asarray(x_pred), np.asarray(xr), rtol=2e-2, atol=2e-2)
    np.testing.assert_allclose(float(loss), float(lr), rtol=2e-2, atol=1e-5)

    print("KERNEL_OK")
</pallas_src>

<mosaic_0001>
module attributes {stable_mosaic.version = 11 : i64} {
  func.func @forecast_kernel(%arg0: memref<8x1xi32, #tpu.memory_space<vmem>>, %arg1: memref<64x128xf32, #tpu.memory_space<vmem>>, %arg2: memref<256x128xf32, #tpu.memory_space<vmem>>, %arg3: memref<1x128xf32, #tpu.memory_space<vmem>>, %arg4: memref<128x256xf32, #tpu.memory_space<vmem>>, %arg5: memref<1x256xf32, #tpu.memory_space<vmem>>, %arg6: memref<256x256xf32, #tpu.memory_space<vmem>>, %arg7: memref<1x256xf32, #tpu.memory_space<vmem>>, %arg8: memref<256x128xf32, #tpu.memory_space<vmem>>, %arg9: memref<1x128xf32, #tpu.memory_space<vmem>>, %arg10: memref<8x128xf32, #tpu.memory_space<vmem>>, %arg11: memref<64x128xf32, #tpu.memory_space<vmem>>) attributes {dimension_semantics = [], scalar_prefetch = 0 : i64, scratch_operands = 0 : i64, tpu.core_type = #tpu.core_type<tc>} {
    %c0 = arith.constant 0 : index
    %c0_0 = arith.constant 0 : index
    %0 = vector.load %arg3[%c0, %c0_0] : memref<1x128xf32, #tpu.memory_space<vmem>>, vector<1x128xf32>
    %c0_1 = arith.constant 0 : index
    %c0_2 = arith.constant 0 : index
    %1 = vector.load %arg1[%c0_1, %c0_2] : memref<64x128xf32, #tpu.memory_space<vmem>>, vector<64x128xf32>
    %c0_3 = arith.constant 0 : index
    %c0_4 = arith.constant 0 : index
    %2 = vector.load %arg2[%c0_3, %c0_4] : memref<256x128xf32, #tpu.memory_space<vmem>>, vector<128x128xf32>
    %cst = arith.constant dense<0.000000e+00> : vector<64x128xf32>
    %3 = tpu.matmul %1, %2, %cst {dimension_numbers = #tpu.dot_dimension_numbers<[1], [0], [0], [1], [0, 0, 1, 1], [], []>} : vector<64x128xf32>, vector<128x128xf32>, vector<64x128xf32> -> vector<64x128xf32>
    %4 = vector.broadcast %0 : vector<1x128xf32> to vector<64x128xf32>
    %5 = arith.addf %3, %4 : vector<64x128xf32>
    %cst_5 = arith.constant 0.000000e+00 : f32
    %6 = vector.broadcast %cst_5 : f32 to vector<8x128xf32>
    %7 = vector.extract_strided_slice %5 {offsets = [0, 0], sizes = [8, 128], strides = [1, 1]} : vector<64x128xf32> to vector<8x128xf32>
    %c128 = arith.constant 128 : index
    %c0_6 = arith.constant 0 : index
    %8 = vector.load %arg2[%c128, %c0_6] : memref<256x128xf32, #tpu.memory_space<vmem>>, vector<128x128xf32>
    %cst_7 = arith.constant dense<0.000000e+00> : vector<8x128xf32>
    %9 = tpu.matmul %6, %8, %cst_7 {dimension_numbers = #tpu.dot_dimension_numbers<[1], [0], [0], [1], [0, 0, 1, 1], [], []>} : vector<8x128xf32>, vector<128x128xf32>, vector<8x128xf32> -> vector<8x128xf32>
    %10 = arith.addf %7, %9 : vector<8x128xf32>
    %11 = math.tanh %10 : vector<8x128xf32>
    %12 = vector.extract_strided_slice %5 {offsets = [8, 0], sizes = [8, 128], strides = [1, 1]} : vector<64x128xf32> to vector<8x128xf32>
    %c128_8 = arith.constant 128 : index
    %c0_9 = arith.constant 0 : index
    %13 = vector.load %arg2[%c128_8, %c0_9] : memref<256x128xf32, #tpu.memory_space<vmem>>, vector<128x128xf32>
    %cst_10 = arith.constant dense<0.000000e+00> : vector<8x128xf32>
    %14 = tpu.matmul %11, %13, %cst_10 {dimension_numbers = #tpu.dot_dimension_numbers<[1], [0], [0], [1], [0, 0, 1, 1], [], []>} : vector<8x128xf32>, vector<128x128xf32>, vector<8x128xf32> -> vector<8x128xf32>
    %15 = arith.addf %12, %14 : vector<8x128xf32>
    %16 = math.tanh %15 : vector<8x128xf32>
    %17 = vector.extract_strided_slice %5 {offsets = [16, 0], sizes = [8, 128], strides = [1, 1]} : vector<64x128xf32> to vector<8x128xf32>
    %c128_11 = arith.constant 128 : index
    %c0_12 = arith.constant 0 : index
    %18 = vector.load %arg2[%c128_11, %c0_12] : memref<256x128xf32, #tpu.memory_space<vmem>>, vector<128x128xf32>
    %cst_13 = arith.constant dense<0.000000e+00> : vector<8x128xf32>
    %19 = tpu.matmul %16, %18, %cst_13 {dimension_numbers = #tpu.dot_dimension_numbers<[1], [0], [0], [1], [0, 0, 1, 1], [], []>} : vector<8x128xf32>, vector<128x128xf32>, vector<8x128xf32> -> vector<8x128xf32>
    %20 = arith.addf %17, %19 : vector<8x128xf32>
    %21 = math.tanh %20 : vector<8x128xf32>
    %22 = vector.extract_strided_slice %5 {offsets = [24, 0], sizes = [8, 128], strides = [1, 1]} : vector<64x128xf32> to vector<8x128xf32>
    %c128_14 = arith.constant 128 : index
    %c0_15 = arith.constant 0 : index
    %23 = vector.load %arg2[%c128_14, %c0_15] : memref<256x128xf32, #tpu.memory_space<vmem>>, vector<128x128xf32>
    %cst_16 = arith.constant dense<0.000000e+00> : vector<8x128xf32>
    %24 = tpu.matmul %21, %23, %cst_16 {dimension_numbers = #tpu.dot_dimension_numbers<[1], [0], [0], [1], [0, 0, 1, 1], [], []>} : vector<8x128xf32>, vector<128x128xf32>, vector<8x128xf32> -> vector<8x128xf32>
    %25 = arith.addf %22, %24 : vector<8x128xf32>
    %26 = math.tanh %25 : vector<8x128xf32>
    %27 = vector.extract_strided_slice %5 {offsets = [32, 0], sizes = [8, 128], strides = [1, 1]} : vector<64x128xf32> to vector<8x128xf32>
    %c128_17 = arith.constant 128 : index
    %c0_18 = arith.constant 0 : index
    %28 = vector.load %arg2[%c128_17, %c0_18] : memref<256x128xf32, #tpu.memory_space<vmem>>, vector<128x128xf32>
    %cst_19 = arith.constant dense<0.000000e+00> : vector<8x128xf32>
    %29 = tpu.matmul %26, %28, %cst_19 {dimension_numbers = #tpu.dot_dimension_numbers<[1], [0], [0], [1], [0, 0, 1, 1], [], []>} : vector<8x128xf32>, vector<128x128xf32>, vector<8x128xf32> -> vector<8x128xf32>
    %30 = arith.addf %27, %29 : vector<8x128xf32>
    %31 = math.tanh %30 : vector<8x128xf32>
    %32 = vector.extract_strided_slice %5 {offsets = [40, 0], sizes = [8, 128], strides = [1, 1]} : vector<64x128xf32> to vector<8x128xf32>
    %c128_20 = arith.constant 128 : index
    %c0_21 = arith.constant 0 : index
    %33 = vector.load %arg2[%c128_20, %c0_21] : memref<256x128xf32, #tpu.memory_space<vmem>>, vector<128x128xf32>
    %cst_22 = arith.constant dense<0.000000e+00> : vector<8x128xf32>
    %34 = tpu.matmul %31, %33, %cst_22 {dimension_numbers = #tpu.dot_dimension_numbers<[1], [0], [0], [1], [0, 0, 1, 1], [], []>} : vector<8x128xf32>, vector<128x128xf32>, vector<8x128xf32> -> vector<8x128xf32>
    %35 = arith.addf %32, %34 : vector<8x128xf32>
    %36 = math.tanh %35 : vector<8x128xf32>
    %37 = vector.extract_strided_slice %5 {offsets = [48, 0], sizes = [8, 128], strides = [1, 1]} : vector<64x128xf32> to vector<8x128xf32>
    %c128_23 = arith.constant 128 : index
    %c0_24 = arith.constant 0 : index
    %38 = vector.load %arg2[%c128_23, %c0_24] : memref<256x128xf32, #tpu.memory_space<vmem>>, vector<128x128xf32>
    %cst_25 = arith.constant dense<0.000000e+00> : vector<8x128xf32>
    %39 = tpu.matmul %36, %38, %cst_25 {dimension_numbers = #tpu.dot_dimension_numbers<[1], [0], [0], [1], [0, 0, 1, 1], [], []>} : vector<8x128xf32>, vector<128x128xf32>, vector<8x128xf32> -> vector<8x128xf32>
    %40 = arith.addf %37, %39 : vector<8x128xf32>
    %41 = math.tanh %40 : vector<8x128xf32>
    %42 = vector.extract_strided_slice %5 {offsets = [56, 0], sizes = [8, 128], strides = [1, 1]} : vector<64x128xf32> to vector<8x128xf32>
    %c128_26 = arith.constant 128 : index
    %c0_27 = arith.constant 0 : index
    %43 = vector.load %arg2[%c128_26, %c0_27] : memref<256x128xf32, #tpu.memory_space<vmem>>, vector<128x128xf32>
    %cst_28 = arith.constant dense<0.000000e+00> : vector<8x128xf32>
    %44 = tpu.matmul %41, %43, %cst_28 {dimension_numbers = #tpu.dot_dimension_numbers<[1], [0], [0], [1], [0, 0, 1, 1], [], []>} : vector<8x128xf32>, vector<128x128xf32>, vector<8x128xf32> -> vector<8x128xf32>
    %45 = arith.addf %42, %44 : vector<8x128xf32>
    %46 = math.tanh %45 : vector<8x128xf32>
    %47 = tpu.concatenate %11, %16, %21, %26, %31, %36, %41, %46 in 0 : vector<8x128xf32>, vector<8x128xf32>, vector<8x128xf32>, vector<8x128xf32>, vector<8x128xf32>, vector<8x128xf32>, vector<8x128xf32>, vector<8x128xf32> -> vector<64x128xf32>
    %48 = arith.truncf %47 : vector<64x128xf32> to vector<64x128xbf16>
    %c0_29 = arith.constant 0 : index
    %c0_30 = arith.constant 0 : index
    %49 = vector.load %arg4[%c0_29, %c0_30] : memref<128x256xf32, #tpu.memory_space<vmem>>, vector<128x256xf32>
    %50 = arith.truncf %49 : vector<128x256xf32> to vector<128x256xbf16>
    %cst_31 = arith.constant dense<0.000000e+00> : vector<64x256xf32>
    %51 = tpu.matmul %48, %50, %cst_31 {dimension_numbers = #tpu.dot_dimension_numbers<[1], [0], [0], [1], [0, 0, 1, 1], [], []>} : vector<64x128xbf16>, vector<128x256xbf16>, vector<64x256xf32> -> vector<64x256xf32>
    %c0_32 = arith.constant 0 : index
    %c0_33 = arith.constant 0 : index
    %52 = vector.load %arg5[%c0_32, %c0_33] : memref<1x256xf32, #tpu.memory_space<vmem>>, vector<1x256xf32>
    %53 = vector.broadcast %52 : vector<1x256xf32> to vector<64x256xf32>
    %54 = arith.addf %51, %53 : vector<64x256xf32>
    %cst_34 = arith.constant 0.000000e+00 : f32
    %55 = vector.broadcast %cst_34 : f32 to vector<64x256xf32>
    %56 = arith.maximumf %54, %55 : vector<64x256xf32>
    %57 = arith.truncf %56 : vector<64x256xf32> to vector<64x256xbf16>
    %c0_35 = arith.constant 0 : index
    %c0_36 = arith.constant 0 : index
    %58 = vector.load %arg6[%c0_35, %c0_36] : memref<256x256xf32, #tpu.memory_space<vmem>>, vector<256x256xf32>
    %59 = arith.truncf %58 : vector<256x256xf32> to vector<256x256xbf16>
    %cst_37 = arith.constant dense<0.000000e+00> : vector<64x256xf32>
    %60 = tpu.matmul %57, %59, %cst_37 {dimension_numbers = #tpu.dot_dimension_numbers<[1], [0], [0], [1], [0, 0, 1, 1], [], []>} : vector<64x256xbf16>, vector<256x256xbf16>, vector<64x256xf32> -> vector<64x256xf32>
    %c0_38 = arith.constant 0 : index
    %c0_39 = arith.constant 0 : index
    %61 = vector.load %arg7[%c0_38, %c0_39] : memref<1x256xf32, #tpu.memory_space<vmem>>, vector<1x256xf32>
    %62 = vector.broadcast %61 : vector<1x256xf32> to vector<64x256xf32>
    %63 = arith.addf %60, %62 : vector<64x256xf32>
    %cst_40 = arith.constant 0.000000e+00 : f32
    %64 = vector.broadcast %cst_40 : f32 to vector<64x256xf32>
    %65 = arith.maximumf %63, %64 : vector<64x256xf32>
    %66 = arith.truncf %65 : vector<64x256xf32> to vector<64x256xbf16>
    %c0_41 = arith.constant 0 : index
    %c0_42 = arith.constant 0 : index
    %67 = vector.load %arg8[%c0_41, %c0_42] : memref<256x128xf32, #tpu.memory_space<vmem>>, vector<256x128xf32>
    %68 = arith.truncf %67 : vector<256x128xf32> to vector<256x128xbf16>
    %cst_43 = arith.constant dense<0.000000e+00> : vector<64x128xf32>
    %69 = tpu.matmul %66, %68, %cst_43 {dimension_numbers = #tpu.dot_dimension_numbers<[1], [0], [0], [1], [0, 0, 1, 1], [], []>} : vector<64x256xbf16>, vector<256x128xbf16>, vector<64x128xf32> -> vector<64x128xf32>
    %c0_44 = arith.constant 0 : index
    %c0_45 = arith.constant 0 : index
    %70 = vector.load %arg9[%c0_44, %c0_45] : memref<1x128xf32, #tpu.memory_space<vmem>>, vector<1x128xf32>
    %71 = vector.broadcast %70 : vector<1x128xf32> to vector<64x128xf32>
    %72 = arith.addf %69, %71 : vector<64x128xf32>
    %c0_46 = arith.constant 0 : index
    %c0_47 = arith.constant 0 : index
    %73 = vector.load %arg11[%c0_46, %c0_47] : memref<64x128xf32, #tpu.memory_space<vmem>>, vector<64x128xf32>
    tpu.vector_store %arg11[%c0_46, %c0_47], %72 {strides = array<i32>} : memref<64x128xf32, #tpu.memory_space<vmem>>, vector<64x128xf32>,
    %c0_48 = arith.constant 0 : index
    %c0_49 = arith.constant 0 : index
    %74 = vector.load %arg0[%c0_48, %c0_49] : memref<8x1xi32, #tpu.memory_space<vmem>>, vector<8x1xi32>
    %c1_i32 = arith.constant 1 : i32
    %75 = vector.broadcast %c1_i32 : i32 to vector<8x1xi32>
    %76 = arith.subi %74, %75 : vector<8x1xi32>
    %77 = vector.shape_cast %76 : vector<8x1xi32> to vector<8x1xi32>
    %78 = vector.broadcast %77 : vector<8x1xi32> to vector<8x128xi32>
    %79 = vector.extract_strided_slice %72 {offsets = [56, 0], sizes = [8, 128], strides = [1, 1]} : vector<64x128xf32> to vector<8x128xf32>
    %cst_50 = arith.constant 0.000000e+00 : f32
    %80 = vector.broadcast %cst_50 : f32 to vector<8x128xf32>
    %c0_i32 = arith.constant 0 : i32
    %81 = tpu.concatenate %79, %46 in 1 : vector<8x128xf32>, vector<8x128xf32> -> vector<8x256xf32>
    %c0_51 = arith.constant 0 : index
    %c0_52 = arith.constant 0 : index
    %82 = vector.load %arg2[%c0_51, %c0_52] : memref<256x128xf32, #tpu.memory_space<vmem>>, vector<256x128xf32>
    %cst_53 = arith.constant dense<0.000000e+00> : vector<8x128xf32>
    %83 = tpu.matmul %81, %82, %cst_53 {dimension_numbers = #tpu.dot_dimension_numbers<[1], [0], [0], [1], [0, 0, 1, 1], [], []>} : vector<8x256xf32>, vector<256x128xf32>, vector<8x128xf32> -> vector<8x128xf32>
    %84 = vector.broadcast %0 : vector<1x128xf32> to vector<8x128xf32>
    %85 = arith.addf %83, %84 : vector<8x128xf32>
    %86 = math.tanh %85 : vector<8x128xf32>
    %c0_54 = arith.constant 0 : index
    %c0_55 = arith.constant 0 : index
    %87 = vector.load %arg4[%c0_54, %c0_55] : memref<128x256xf32, #tpu.memory_space<vmem>>, vector<128x256xf32>
    %cst_56 = arith.constant dense<0.000000e+00> : vector<8x256xf32>
    %88 = tpu.matmul %86, %87, %cst_56 {dimension_numbers = #tpu.dot_dimension_numbers<[1], [0], [0], [1], [0, 0, 1, 1], [], []>} : vector<8x128xf32>, vector<128x256xf32>, vector<8x256xf32> -> vector<8x256xf32>
    %c0_57 = arith.constant 0 : index
    %c0_58 = arith.constant 0 : index
    %89 = vector.load %arg5[%c0_57, %c0_58] : memref<1x256xf32, #tpu.memory_space<vmem>>, vector<1x256xf32>
    %90 = vector.broadcast %89 : vector<1x256xf32> to vector<8x256xf32>
    %91 = arith.addf %88, %90 : vector<8x256xf32>
    %cst_59 = arith.constant 0.000000e+00 : f32
    %92 = vector.broadcast %cst_59 : f32 to vector<8x256xf32>
    %93 = arith.maximumf %91, %92 : vector<8x256xf32>
    %c0_60 = arith.constant 0 : index
    %c0_61 = arith.constant 0 : index
    %94 = vector.load %arg6[%c0_60, %c0_61] : memref<256x256xf32, #tpu.memory_space<vmem>>, vector<256x256xf32>
    %cst_62 = arith.constant dense<0.000000e+00> : vector<8x256xf32>
    %95 = tpu.matmul %93, %94, %cst_62 {dimension_numbers = #tpu.dot_dimension_numbers<[1], [0], [0], [1], [0, 0, 1, 1], [], []>} : vector<8x256xf32>, vector<256x256xf32>, vector<8x256xf32> -> vector<8x256xf32>
    %c0_63 = arith.constant 0 : index
    %c0_64 = arith.constant 0 : index
    %96 = vector.load %arg7[%c0_63, %c0_64] : memref<1x256xf32, #tpu.memory_space<vmem>>, vector<1x256xf32>
    %97 = vector.broadcast %96 : vector<1x256xf32> to vector<8x256xf32>
    %98 = arith.addf %95, %97 : vector<8x256xf32>
    %cst_65 = arith.constant 0.000000e+00 : f32
    %99 = vector.broadcast %cst_65 : f32 to vector<8x256xf32>
    %100 = arith.maximumf %98, %99 : vector<8x256xf32>
    %c0_66 = arith.constant 0 : index
    %c0_67 = arith.constant 0 : index
    %101 = vector.load %arg8[%c0_66, %c0_67] : memref<256x128xf32, #tpu.memory_space<vmem>>, vector<256x128xf32>
    %cst_68 = arith.constant dense<0.000000e+00> : vector<8x128xf32>
    %102 = tpu.matmul %100, %101, %cst_68 {dimension_numbers = #tpu.dot_dimension_numbers<[1], [0], [0], [1], [0, 0, 1, 1], [], []>} : vector<8x256xf32>, vector<256x128xf32>, vector<8x128xf32> -> vector<8x128xf32>
    %c0_69 = arith.constant 0 : index
    %c0_70 = arith.constant 0 : index
    %103 = vector.load %arg9[%c0_69, %c0_70] : memref<1x128xf32, #tpu.memory_space<vmem>>, vector<1x128xf32>
    %104 = vector.broadcast %103 : vector<1x128xf32> to vector<8x128xf32>
    %105 = arith.addf %102, %104 : vector<8x128xf32>
    %106 = vector.broadcast %c0_i32 : i32 to vector<8x128xi32>
    %107 = arith.cmpi eq, %78, %106 : vector<8x128xi32>
    %108 = arith.select %107, %105, %80 : vector<8x128xi1>, vector<8x128xf32>
    %c1_i32_71 = arith.constant 1 : i32
    %109 = tpu.concatenate %105, %86 in 1 : vector<8x128xf32>, vector<8x128xf32> -> vector<8x256xf32>
    %c0_72 = arith.constant 0 : index
    %c0_73 = arith.constant 0 : index
    %110 = vector.load %arg2[%c0_72, %c0_73] : memref<256x128xf32, #tpu.memory_space<vmem>>, vector<256x128xf32>
    %cst_74 = arith.constant dense<0.000000e+00> : vector<8x128xf32>
    %111 = tpu.matmul %109, %110, %cst_74 {dimension_numbers = #tpu.dot_dimension_numbers<[1], [0], [0], [1], [0, 0, 1, 1], [], []>} : vector<8x256xf32>, vector<256x128xf32>, vector<8x128xf32> -> vector<8x128xf32>
    %112 = vector.broadcast %0 : vector<1x128xf32> to vector<8x128xf32>
    %113 = arith.addf %111, %112 : vector<8x128xf32>
    %114 = math.tanh %113 : vector<8x128xf32>
    %c0_75 = arith.constant 0 : index
    %c0_76 = arith.constant 0 : index
    %115 = vector.load %arg4[%c0_75, %c0_76] : memref<128x256xf32, #tpu.memory_space<vmem>>, vector<128x256xf32>
    %cst_77 = arith.constant dense<0.000000e+00> : vector<8x256xf32>
    %116 = tpu.matmul %114, %115, %cst_77 {dimension_numbers = #tpu.dot_dimension_numbers<[1], [0], [0], [1], [0, 0, 1, 1], [], []>} : vector<8x128xf32>, vector<128x256xf32>, vector<8x256xf32> -> vector<8x256xf32>
    %c0_78 = arith.constant 0 : index
    %c0_79 = arith.constant 0 : index
    %117 = vector.load %arg5[%c0_78, %c0_79] : memref<1x256xf32, #tpu.memory_space<vmem>>, vector<1x256xf32>
    %118 = vector.broadcast %117 : vector<1x256xf32> to vector<8x256xf32>
    %119 = arith.addf %116, %118 : vector<8x256xf32>
    %cst_80 = arith.constant 0.000000e+00 : f32
    %120 = vector.broadcast %cst_80 : f32 to vector<8x256xf32>
    %121 = arith.maximumf %119, %120 : vector<8x256xf32>
    %c0_81 = arith.constant 0 : index
    %c0_82 = arith.constant 0 : index
    %122 = vector.load %arg6[%c0_81, %c0_82] : memref<256x256xf32, #tpu.memory_space<vmem>>, vector<256x256xf32>
    %cst_83 = arith.constant dense<0.000000e+00> : vector<8x256xf32>
    %123 = tpu.matmul %121, %122, %cst_83 {dimension_numbers = #tpu.dot_dimension_numbers<[1], [0], [0], [1], [0, 0, 1, 1], [], []>} : vector<8x256xf32>, vector<256x256xf32>, vector<8x256xf32> -> vector<8x256xf32>
    %c0_84 = arith.constant 0 : index
    %c0_85 = arith.constant 0 : index
    %124 = vector.load %arg7[%c0_84, %c0_85] : memref<1x256xf32, #tpu.memory_space<vmem>>, vector<1x256xf32>
    %125 = vector.broadcast %124 : vector<1x256xf32> to vector<8x256xf32>
    %126 = arith.addf %123, %125 : vector<8x256xf32>
    %cst_86 = arith.constant 0.000000e+00 : f32
    %127 = vector.broadcast %cst_86 : f32 to vector<8x256xf32>
    %128 = arith.maximumf %126, %127 : vector<8x256xf32>
    %c0_87 = arith.constant 0 : index
    %c0_88 = arith.constant 0 : index
    %129 = vector.load %arg8[%c0_87, %c0_88] : memref<256x128xf32, #tpu.memory_space<vmem>>, vector<256x128xf32>
    %cst_89 = arith.constant dense<0.000000e+00> : vector<8x128xf32>
    %130 = tpu.matmul %128, %129, %cst_89 {dimension_numbers = #tpu.dot_dimension_numbers<[1], [0], [0], [1], [0, 0, 1, 1], [], []>} : vector<8x256xf32>, vector<256x128xf32>, vector<8x128xf32> -> vector<8x128xf32>
    %c0_90 = arith.constant 0 : index
    %c0_91 = arith.constant 0 : index
    %131 = vector.load %arg9[%c0_90, %c0_91] : memref<1x128xf32, #tpu.memory_space<vmem>>, vector<1x128xf32>
    %132 = vector.broadcast %131 : vector<1x128xf32> to vector<8x128xf32>
    %133 = arith.addf %130, %132 : vector<8x128xf32>
    %134 = vector.broadcast %c1_i32_71 : i32 to vector<8x128xi32>
    %135 = arith.cmpi eq, %78, %134 : vector<8x128xi32>
    %136 = arith.select %135, %133, %108 : vector<8x128xi1>, vector<8x128xf32>
    %c2_i32 = arith.constant 2 : i32
    %137 = tpu.concatenate %133, %114 in 1 : vector<8x128xf32>, vector<8x128xf32> -> vector<8x256xf32>
    %c0_92 = arith.constant 0 : index
    %c0_93 = arith.constant 0 : index
    %138 = vector.load %arg2[%c0_92, %c0_93] : memref<256x128xf32, #tpu.memory_space<vmem>>, vector<256x128xf32>
    %cst_94 = arith.constant dense<0.000000e+00> : vector<8x128xf32>
    %139 = tpu.matmul %137, %138, %cst_94 {dimension_numbers = #tpu.dot_dimension_numbers<[1], [0], [0], [1], [0, 0, 1, 1], [], []>} : vector<8x256xf32>, vector<256x128xf32>, vector<8x128xf32> -> vector<8x128xf32>
    %140 = vector.broadcast %0 : vector<1x128xf32> to vector<8x128xf32>
    %141 = arith.addf %139, %140 : vector<8x128xf32>
    %142 = math.tanh %141 : vector<8x128xf32>
    %c0_95 = arith.constant 0 : index
    %c0_96 = arith.constant 0 : index
    %143 = vector.load %arg4[%c0_95, %c0_96] : memref<128x256xf32, #tpu.memory_space<vmem>>, vector<128x256xf32>
    %cst_97 = arith.constant dense<0.000000e+00> : vector<8x256xf32>
    %144 = tpu.matmul %142, %143, %cst_97 {dimension_numbers = #tpu.dot_dimension_numbers<[1], [0], [0], [1], [0, 0, 1, 1], [], []>} : vector<8x128xf32>, vector<128x256xf32>, vector<8x256xf32> -> vector<8x256xf32>
    %c0_98 = arith.constant 0 : index
    %c0_99 = arith.constant 0 : index
    %145 = vector.load %arg5[%c0_98, %c0_99] : memref<1x256xf32, #tpu.memory_space<vmem>>, vector<1x256xf32>
    %146 = vector.broadcast %145 : vector<1x256xf32> to vector<8x256xf32>
    %147 = arith.addf %144, %146 : vector<8x256xf32>
    %cst_100 = arith.constant 0.000000e+00 : f32
    %148 = vector.broadcast %cst_100 : f32 to vector<8x256xf32>
    %149 = arith.maximumf %147, %148 : vector<8x256xf32>
    %c0_101 = arith.constant 0 : index
    %c0_102 = arith.constant 0 : index
    %150 = vector.load %arg6[%c0_101, %c0_102] : memref<256x256xf32, #tpu.memory_space<vmem>>, vector<256x256xf32>
    %cst_103 = arith.constant dense<0.000000e+00> : vector<8x256xf32>
    %151 = tpu.matmul %149, %150, %cst_103 {dimension_numbers = #tpu.dot_dimension_numbers<[1], [0], [0], [1], [0, 0, 1, 1], [], []>} : vector<8x256xf32>, vector<256x256xf32>, vector<8x256xf32> -> vector<8x256xf32>
    %c0_104 = arith.constant 0 : index
    %c0_105 = arith.constant 0 : index
    %152 = vector.load %arg7[%c0_104, %c0_105] : memref<1x256xf32, #tpu.memory_space<vmem>>, vector<1x256xf32>
    %153 = vector.broadcast %152 : vector<1x256xf32> to vector<8x256xf32>
    %154 = arith.addf %151, %153 : vector<8x256xf32>
    %cst_106 = arith.constant 0.000000e+00 : f32
    %155 = vector.broadcast %cst_106 : f32 to vector<8x256xf32>
    %156 = arith.maximumf %154, %155 : vector<8x256xf32>
    %c0_107 = arith.constant 0 : index
    %c0_108 = arith.constant 0 : index
    %157 = vector.load %arg8[%c0_107, %c0_108] : memref<256x128xf32, #tpu.memory_space<vmem>>, vector<256x128xf32>
    %cst_109 = arith.constant dense<0.000000e+00> : vector<8x128xf32>
    %158 = tpu.matmul %156, %157, %cst_109 {dimension_numbers = #tpu.dot_dimension_numbers<[1], [0], [0], [1], [0, 0, 1, 1], [], []>} : vector<8x256xf32>, vector<256x128xf32>, vector<8x128xf32> -> vector<8x128xf32>
    %c0_110 = arith.constant 0 : index
    %c0_111 = arith.constant 0 : index
    %159 = vector.load %arg9[%c0_110, %c0_111] : memref<1x128xf32, #tpu.memory_space<vmem>>, vector<1x128xf32>
    %160 = vector.broadcast %159 : vector<1x128xf32> to vector<8x128xf32>
    %161 = arith.addf %158, %160 : vector<8x128xf32>
    %162 = vector.broadcast %c2_i32 : i32 to vector<8x128xi32>
    %163 = arith.cmpi eq, %78, %162 : vector<8x128xi32>
    %164 = arith.select %163, %161, %136 : vector<8x128xi1>, vector<8x128xf32>
    %c3_i32 = arith.constant 3 : i32
    %165 = tpu.concatenate %161, %142 in 1 : vector<8x128xf32>, vector<8x128xf32> -> vector<8x256xf32>
    %c0_112 = arith.constant 0 : index
    %c0_113 = arith.constant 0 : index
    %166 = vector.load %arg2[%c0_112, %c0_113] : memref<256x128xf32, #tpu.memory_space<vmem>>, vector<256x128xf32>
    %cst_114 = arith.constant dense<0.000000e+00> : vector<8x128xf32>
    %167 = tpu.matmul %165, %166, %cst_114 {dimension_numbers = #tpu.dot_dimension_numbers<[1], [0], [0], [1], [0, 0, 1, 1], [], []>} : vector<8x256xf32>, vector<256x128xf32>, vector<8x128xf32> -> vector<8x128xf32>
    %168 = vector.broadcast %0 : vector<1x128xf32> to vector<8x128xf32>
    %169 = arith.addf %167, %168 : vector<8x128xf32>
    %170 = math.tanh %169 : vector<8x128xf32>
    %c0_115 = arith.constant 0 : index
    %c0_116 = arith.constant 0 : index
    %171 = vector.load %arg4[%c0_115, %c0_116] : memref<128x256xf32, #tpu.memory_space<vmem>>, vector<128x256xf32>
    %cst_117 = arith.constant dense<0.000000e+00> : vector<8x256xf32>
    %172 = tpu.matmul %170, %171, %cst_117 {dimension_numbers = #tpu.dot_dimension_numbers<[1], [0], [0], [1], [0, 0, 1, 1], [], []>} : vector<8x128xf32>, vector<128x256xf32>, vector<8x256xf32> -> vector<8x256xf32>
    %c0_118 = arith.constant 0 : index
    %c0_119 = arith.constant 0 : index
    %173 = vector.load %arg5[%c0_118, %c0_119] : memref<1x256xf32, #tpu.memory_space<vmem>>, vector<1x256xf32>
    %174 = vector.broadcast %173 : vector<1x256xf32> to vector<8x256xf32>
    %175 = arith.addf %172, %174 : vector<8x256xf32>
    %cst_120 = arith.constant 0.000000e+00 : f32
    %176 = vector.broadcast %cst_120 : f32 to vector<8x256xf32>
    %177 = arith.maximumf %175, %176 : vector<8x256xf32>
    %c0_121 = arith.constant 0 : index
    %c0_122 = arith.constant 0 : index
    %178 = vector.load %arg6[%c0_121, %c0_122] : memref<256x256xf32, #tpu.memory_space<vmem>>, vector<256x256xf32>
    %cst_123 = arith.constant dense<0.000000e+00> : vector<8x256xf32>
    %179 = tpu.matmul %177, %178, %cst_123 {dimension_numbers = #tpu.dot_dimension_numbers<[1], [0], [0], [1], [0, 0, 1, 1], [], []>} : vector<8x256xf32>, vector<256x256xf32>, vector<8x256xf32> -> vector<8x256xf32>
    %c0_124 = arith.constant 0 : index
    %c0_125 = arith.constant 0 : index
    %180 = vector.load %arg7[%c0_124, %c0_125] : memref<1x256xf32, #tpu.memory_space<vmem>>, vector<1x256xf32>
    %181 = vector.broadcast %180 : vector<1x256xf32> to vector<8x256xf32>
    %182 = arith.addf %179, %181 : vector<8x256xf32>
    %cst_126 = arith.constant 0.000000e+00 : f32
    %183 = vector.broadcast %cst_126 : f32 to vector<8x256xf32>
    %184 = arith.maximumf %182, %183 : vector<8x256xf32>
    %c0_127 = arith.constant 0 : index
    %c0_128 = arith.constant 0 : index
    %185 = vector.load %arg8[%c0_127, %c0_128] : memref<256x128xf32, #tpu.memory_space<vmem>>, vector<256x128xf32>
    %cst_129 = arith.constant dense<0.000000e+00> : vector<8x128xf32>
    %186 = tpu.matmul %184, %185, %cst_129 {dimension_numbers = #tpu.dot_dimension_numbers<[1], [0], [0], [1], [0, 0, 1, 1], [], []>} : vector<8x256xf32>, vector<256x128xf32>, vector<8x128xf32> -> vector<8x128xf32>
    %c0_130 = arith.constant 0 : index
    %c0_131 = arith.constant 0 : index
    %187 = vector.load %arg9[%c0_130, %c0_131] : memref<1x128xf32, #tpu.memory_space<vmem>>, vector<1x128xf32>
    %188 = vector.broadcast %187 : vector<1x128xf32> to vector<8x128xf32>
    %189 = arith.addf %186, %188 : vector<8x128xf32>
    %190 = vector.broadcast %c3_i32 : i32 to vector<8x128xi32>
    %191 = arith.cmpi eq, %78, %190 : vector<8x128xi32>
    %192 = arith.select %191, %189, %164 : vector<8x128xi1>, vector<8x128xf32>
    %c4_i32 = arith.constant 4 : i32
    %c0_132 = arith.constant 0 : index
    %c0_133 = arith.constant 0 : index
    %193 = vector.load %arg10[%c0_132, %c0_133] : memref<8x128xf32, #tpu.memory_space<vmem>>, vector<8x128xf32>
    tpu.vector_store %arg10[%c0_132, %c0_133], %192 {strides = array<i32>} : memref<8x128xf32, #tpu.memory_space<vmem>>, vector<8x128xf32>,
    return
  }
}

</mosaic_0001>

<bundles_post_ra>
// kernel: forecast_rnn_forward.1
= control target key start
LH: loop header
LB: loop body
LE: loop exit
PB: predicated region body
PF: predicated region fallthrough
CT: control target
= control target key end

     0   :  { %v4324_v2 = vmov 0.0|0.0   ;;  %vm4325_vm0 = vmmov 0   ;;  %v6071_v4 = vmov 0.0   ;;  %s6059_s2 = inlined_call_operand.vmem [shape: f32[256,128], index: 2, kind: input, shape index: {}]   ;;  %s6060_s1 = inlined_call_operand.vmem [shape: f32[64,128], index: 1, kind: input, shape index: {}]   ;;  %s6061_s3 = inlined_call_operand.vmem [shape: f32[1,128], index: 3, kind: input, shape index: {}]   ;;  %s6062_s4 = inlined_call_operand.vmem [shape: f32[128,256], index: 4, kind: input, shape index: {}]   ;;  %s6063_s6 = inlined_call_operand.vmem [shape: f32[256,256], index: 6, kind: input, shape index: {}]   ;;  %s6064_s5 = inlined_call_operand.vmem [shape: f32[1,256], index: 5, kind: input, shape index: {}]   ;;  %s6065_s8 = inlined_call_operand.vmem [shape: f32[256,128], index: 8, kind: input, shape index: {}]   ;;  %s6066_s7 = inlined_call_operand.vmem [shape: f32[1,256], index: 7, kind: input, shape index: {}]   ;;  %s6067_s9 = inlined_call_operand.vmem [shape: f32[1,128], index: 9, kind: input, shape index: {}]   ;;  %s6068_s11 = inlined_call_operand.vmem [shape: f32[64,128], index: 11, kind: output, shape index: {1}]   ;;  %s6069_s0 = inlined_call_operand.vmem [shape: s32[8,1], index: 0, kind: input, shape index: {}]   ;;  %s6070_s10 = inlined_call_operand.vmem [shape: f32[8,128], index: 10, kind: output, shape index: {0}]  }
   0x1   :  { %v47_v0 = vld [vmem:[%s6059_s2] sm:$0xff]  ;;  %v48_v1 = vld [vmem:[%s6059_s2 + $0x8] sm:$0xff]  ;;  %3461 = vmatprep.subr.bf16.mxu1 %v4324_v2  ;;  %3181 = vmatprep.mubr.msk.f32.mxu1 %vm4325_vm0, %v6071_v4  ;;  %v49_v7 = vld [vmem:[%s6059_s2 + $0x10] sm:$0xff] }
   0x2   :  { %v174_v3 = vld [vmem:[%s6059_s2 + $0x80] sm:$0xff]  ;;  %v3429_v5 = vpack.c.bf16 %v48_v1, %v47_v0  ;;  %v175_v6 = vld [vmem:[%s6059_s2 + $0x88] sm:$0xff]  ;;  %v50_v8 = vld [vmem:[%s6059_s2 + $0x18] sm:$0xff] }
   0x3   :  { %v4409_v9 = vpack.c.bf16 %v175_v6, %v174_v3  ;;  %v3433_v10 = vpack.c.bf16 %v50_v8, %v49_v7  ;;  %v176_v11 = vld [vmem:[%s6059_s2 + $0x90] sm:$0xff]  ;;  %v177_v12 = vld [vmem:[%s6059_s2 + $0x98] sm:$0xff]  ;;  %v51_v13 = vld [vmem:[%s6059_s2 + $0x20] sm:$0xff] }
   0x4   :  { %3430 = vmatprep.subr.bf16.mxu0 %v3429_v5  ;;  %v52_v14 = vld [vmem:[%s6059_s2 + $0x28] sm:$0xff]  ;;  %v4424_v15 = vpack.c.bf16 %v177_v12, %v176_v11  ;;  %v178_v17 = vld [vmem:[%s6059_s2 + $0xa0] sm:$0xff]  ;;  %v53_v19 = vld [vmem:[%s6059_s2 + $0x30] sm:$0xff] }
   0x5   :  { %3432 = vmatpush3.bf16.msra.mxu0 %v3429_v5  ;;  %3463 = vmatpush3.bf16.msra.mxu1 %v4409_v9  ;;  %v3437_v16 = vpack.c.bf16 %v52_v14, %v51_v13  ;;  %v179_v18 = vld [vmem:[%s6059_s2 + $0xa8] sm:$0xff]  ;;  %v54_v20 = vld [vmem:[%s6059_s2 + $0x38] sm:$0xff]  ;;  %v180_v23 = vld [vmem:[%s6059_s2 + $0xb0] sm:$0xff] }
   0x6   :  { %3434 = vmatprep.subr.bf16.mxu0 %v3433_v10  ;;  %3464 = vmatprep.subr.bf16.mxu1 %v4324_v2  ;;  %v4440_v21 = vpack.c.bf16 %v179_v18, %v178_v17  ;;  %v3441_v22 = vpack.c.bf16 %v54_v20, %v53_v19  ;;  %v181_v24 = vld [vmem:[%s6059_s2 + $0xb8] sm:$0xff]  ;;  %v55_v25 = vld [vmem:[%s6059_s2 + $0x40] sm:$0xff]  ;;  %v56_v26 = vld [vmem:[%s6059_s2 + $0x48] sm:$0xff] }
   0x7   :  { %v39_v27 = vld [vmem:[%s6060_s1] sm:$0xff]  ;;  %v4459_v28 = vpack.c.bf16 %v181_v24, %v180_v23  ;;  %v3445_v29 = vpack.c.bf16 %v56_v26, %v55_v25  ;;  %v183_v31 = vld [vmem:[%s6059_s2 + $0xc8] sm:$0xff]  ;;  %v57_v32 = vld [vmem:[%s6059_s2 + $0x50] sm:$0xff] }
   0x8   :  { %3137 = vmatprep.mubr.f32.mxu0 %v39_v27  ;;  %v182_v30 = vld [vmem:[%s6059_s2 + $0xc0] sm:$0xff]  ;;  %v58_v33 = vld [vmem:[%s6059_s2 + $0x58] sm:$0xff]  ;;  %v184_v36 = vld [vmem:[%s6059_s2 + $0xd0] sm:$0xff] }
   0x9   :  { %3436 = vmatpush3.bf16.msra.mxu0 %v3433_v10  ;;  %3466 = vmatpush3.bf16.msra.mxu1 %v4424_v15  ;;  %v4475_v34 = vpack.c.bf16 %v183_v31, %v182_v30  ;;  %v3449_v35 = vpack.c.bf16 %v58_v33, %v57_v32  ;;  %v185_v37 = vld [vmem:[%s6059_s2 + $0xd8] sm:$0xff]  ;;  %v59_v38 = vld [vmem:[%s6059_s2 + $0x60] sm:$0xff]  ;;  %v60_v39 = vld [vmem:[%s6059_s2 + $0x68] sm:$0xff] }
   0xa   :  { %3438 = vmatprep.subr.bf16.mxu0 %v3437_v16  ;;  %3467 = vmatprep.subr.bf16.mxu1 %v4324_v2  ;;  %v4491_v40 = vpack.c.bf16 %v185_v37, %v184_v36  ;;  %v3453_v41 = vpack.c.bf16 %v60_v39, %v59_v38  ;;  %v186_v42 = vld [vmem:[%s6059_s2 + $0xe0] sm:$0xff]  ;;  %v187_v43 = vld [vmem:[%s6059_s2 + $0xe8] sm:$0xff]  ;;  %v61_v44 = vld [vmem:[%s6059_s2 + $0x70] sm:$0xff] }
   0xb   :  { %v62_v45 = vld [vmem:[%s6059_s2 + $0x78] sm:$0xff]  ;;  %v4507_v46 = vpack.c.bf16 %v187_v43, %v186_v42  ;;  %v188_v48 = vld [vmem:[%s6059_s2 + $0xf0] sm:$0xff]  ;;  %v40_v51 = vld [vmem:[%s6060_s1 + $0x8] sm:$0xff] }
   0xc   :  { %v3457_v47 = vpack.c.bf16 %v62_v45, %v61_v44  ;;  %v189_v49 = vld [vmem:[%s6059_s2 + $0xf8] sm:$0xff]  ;;  %v41_v52 = vld [vmem:[%s6060_s1 + $0x10] sm:$0xff]  ;;  %v43_v54 = vld [vmem:[%s6060_s1 + $0x20] sm:$0xff] }
   0xd   :  { %3440 = vmatpush3.bf16.msra.mxu0 %v3437_v16  ;;  %3469 = vmatpush3.bf16.msra.mxu1 %v4440_v21  ;;  %v4517_v50 = vpack.c.bf16 %v189_v49, %v188_v48  ;;  %v42_v53 = vld [vmem:[%s6060_s1 + $0x18] sm:$0xff]  ;;  %v44_v55 = vld [vmem:[%s6060_s1 + $0x28] sm:$0xff]  ;;  %v45_v56 = vld [vmem:[%s6060_s1 + $0x30] sm:$0xff] }
   0xe   :  { %3442 = vmatprep.subr.bf16.mxu0 %v3441_v22  ;;  %3470 = vmatprep.subr.bf16.mxu1 %v4324_v2  ;;  %v46_v57 = vld [vmem:[%s6060_s1 + $0x38] sm:$0xff]  ;;  %v4584_v58 = vld [vmem:[%s6061_s3] ss:$0 sm:$0xff]  ;;  %v772_v38 = vld [vmem:[%s6062_s4 + $0x10] sm:$0xff] }
   0xf   :  { %v770_v37 = vld [vmem:[%s6062_s4] sm:$0xff]  ;;  %v775_v39 = vld [vmem:[%s6062_s4 + $0x28] sm:$0xff]  ;;  %v776_v44 = vld [vmem:[%s6062_s4 + $0x30] sm:$0xff] }
  0x10   :  { %v774_v43 = vld [vmem:[%s6062_s4 + $0x20] sm:$0xff] }
  0x11   :  { %3444 = vmatpush3.bf16.msra.mxu0 %v3441_v22  ;;  %3472 = vmatpush3.bf16.msra.mxu1 %v4459_v28  ;;  %v804_v48 = vpack.c.bf16 %v776_v44, %v774_v43 }
  0x12   :  { %3446 = vmatprep.subr.bf16.mxu0 %v3445_v29  ;;  %3473 = vmatprep.subr.bf16.mxu1 %v4324_v2 }
  0x15   :  { %3448 = vmatpush3.bf16.msra.mxu0 %v3445_v29  ;;  %3475 = vmatpush3.bf16.msra.mxu1 %v4475_v34 }
  0x16   :  { %3450 = vmatprep.subr.bf16.mxu0 %v3449_v35  ;;  %3476 = vmatprep.subr.bf16.mxu1 %v4324_v2 }
  0x19   :  { %3452 = vmatpush3.bf16.msra.mxu0 %v3449_v35  ;;  %3478 = vmatpush3.bf16.msra.mxu1 %v4491_v40 }
  0x1a   :  { %3454 = vmatprep.subr.bf16.mxu0 %v3453_v41  ;;  %3479 = vmatprep.subr.bf16.mxu1 %v4324_v2 }
  0x1d   :  { %3456 = vmatpush3.bf16.msra.mxu0 %v3453_v41  ;;  %3481 = vmatpush3.bf16.msra.mxu1 %v4507_v46  ;;  %v802_v41 = vpack.c.bf16 %v772_v38, %v770_v37  ;;  %v931_v38 = vld [vmem:[%s6063_s6 + $0x20] sm:$0xff] }
  0x1e   :  { %3458 = vmatprep.subr.bf16.mxu0 %v3457_v47  ;;  %3482 = vmatprep.subr.bf16.mxu1 %v4324_v2 }
  0x21   :  { %3460 = vmatpush3.bf16.msra.mxu0 %v3457_v47  ;;  %3484 = vmatpush3.bf16.msra.mxu1 %v4517_v50  ;;  %v781_v47 = vld [vmem:[%s6062_s4 + $0x58] sm:$0xff] }
  0x22   :  { %3485 = vmatprep.subr.bf16.mxu0 %v4324_v2  ;;  %3509 = vmatprep.subr.bf16.mxu1 %v4324_v2 }
  0x24   :  { %3138 = vmatmul.mubr.f32.vlgmr.msra.gmra.mrb[0].mxu0 %v40_v51  ;;  %3182 = vmatmul.mubr.f32.vlgmr.msra.gmra.mrb[0].mxu1 %v6071_v4  ;;  %v780_v51 = vld [vmem:[%s6062_s4 + $0x50] sm:$0xff] }
  0x25   :  { %3487 = vmatpush3.bf16.msra.mxu0 %v4409_v9  ;;  %3511 = vmatpush3.bf16.msra.mxu1 %v4409_v9 }
  0x26   :  { %3488 = vmatprep.subr.bf16.mxu0 %v4324_v2  ;;  %3512 = vmatprep.subr.bf16.mxu1 %v4324_v2 }
  0x27   :  { %3251 = vmatprep.mubr.msk.f32.mxu1 %vm4325_vm0, %v6071_v4  ;;  %3140 = vmatprep.mubr.f32.mxu0 %v41_v52  ;;  %v783_v52 = vld [vmem:[%s6062_s4 + $0x68] sm:$0xff] }
  0x28   :  { %3141 = vmatmul.mubr.f32.gmra.mrb[2].mxu0 %v42_v53  ;;  %v785_v53 = vld [vmem:[%s6062_s4 + $0x78] sm:$0xff] }
  0x29   :  { %3490 = vmatpush3.bf16.msra.mxu0 %v4424_v15  ;;  %3514 = vmatpush3.bf16.msra.mxu1 %v4424_v15 }
  0x2a   :  { %3491 = vmatprep.subr.bf16.mxu0 %v4324_v2  ;;  %3515 = vmatprep.subr.bf16.mxu1 %v4324_v2 }
  0x2b   :  { %3143 = vmatprep.mubr.f32.mxu0 %v43_v54 }
  0x2c   :  { %3144 = vmatmul.mubr.f32.gmra.mrb[4].mxu0 %v44_v55  ;;  %v809_v55 = vpack.c.bf16 %v785_v53, %v783_v52  ;;  %v939_v52 = vld [vmem:[%s6063_s6 + $0x60] sm:$0xff]  ;;  %v941_v53 = vld [vmem:[%s6063_s6 + $0x70] sm:$0xff] }
  0x2d   :  { %3493 = vmatpush3.bf16.msra.mxu0 %v4440_v21  ;;  %3517 = vmatpush3.bf16.msra.mxu1 %v4440_v21 }
  0x2e   :  { %3494 = vmatprep.subr.bf16.mxu0 %v4324_v2  ;;  %3518 = vmatprep.subr.bf16.mxu1 %v4324_v2 }
  0x2f   :  { %3146 = vmatprep.mubr.f32.mxu0 %v45_v56  ;;  %v782_v56 = vld [vmem:[%s6062_s4 + $0x60] sm:$0xff] }
  0x30   :  { %3147 = vmatmul.mubr.f32.gmra.mrb[6].mxu0 %v46_v57  ;;  %v784_v57 = vld [vmem:[%s6062_s4 + $0x70] sm:$0xff] }
  0x31   :  { %3496 = vmatpush3.bf16.msra.mxu0 %v4459_v28  ;;  %3520 = vmatpush3.bf16.msra.mxu1 %v4459_v28 }
  0x32   :  { %3497 = vmatprep.subr.bf16.mxu0 %v4324_v2  ;;  %3521 = vmatprep.subr.bf16.mxu1 %v4324_v2 }
  0x33   :  { %3216 = vmatprep.mubr.msk.f32.mxu0 %vm4325_vm0, %v6071_v4 }
  0x35   :  { %3499 = vmatpush3.bf16.msra.mxu0 %v4475_v34  ;;  %3523 = vmatpush3.bf16.msra.mxu1 %v4475_v34 }
  0x36   :  { %3500 = vmatprep.subr.bf16.mxu0 %v4324_v2  ;;  %3524 = vmatprep.subr.bf16.mxu1 %v4324_v2 }
  0x39   :  { %3502 = vmatpush3.bf16.msra.mxu0 %v4491_v40  ;;  %3526 = vmatpush3.bf16.msra.mxu1 %v4491_v40 }
  0x3a   :  { %3503 = vmatprep.subr.bf16.mxu0 %v4324_v2  ;;  %3527 = vmatprep.subr.bf16.mxu1 %v4324_v2 }
  0x3d   :  { %3505 = vmatpush3.bf16.msra.mxu0 %v4507_v46  ;;  %3529 = vmatpush3.bf16.msra.mxu1 %v4507_v46 }
  0x3e   :  { %3506 = vmatprep.subr.bf16.mxu0 %v4324_v2  ;;  %3530 = vmatprep.subr.bf16.mxu1 %v4324_v2 }
  0x41   :  { %3508 = vmatpush3.bf16.msra.mxu0 %v4517_v50  ;;  %3532 = vmatpush3.bf16.msra.mxu1 %v4517_v50 }
  0x42   :  { %3533 = vmatprep.subr.bf16.mxu0 %v4324_v2  ;;  %3557 = vmatprep.subr.bf16.mxu1 %v4324_v2 }
  0xf7   :  { %v3139_v59 = vpop.f32.mrb[0].mxu0  ;;  %v256_v60 = vpop.f32.mrb[0].mxu1 }
  0xf8   :  { %v135_v61 = vpop.f32.mrb[1].mxu0  ;;  %v3183_v62 = vpop.f32.mrb[1].mxu1  ;;  %v141_v11 = vadd.f32 %v3139_v59, %v4584_v58  ;;  %v787_v59 = vld [vmem:[%s6062_s4 + $0x88] sm:$0xff] }
  0xf9   :  { %v136_v63 = vadd.f32 %v4584_v58, %v135_v61  ;;  %v808_v61 = vpack.c.bf16 %v784_v57, %v782_v56  ;;  %v997_v57 = vpack.c.bf16 %v941_v53, %v939_v52 }
  0xfb   :  { %v260_v0 = vadd.f32 %v256_v60, %v136_v63  ;;  %v3142_v3 = vpop.f32.mrb[2].mxu0  ;;  %v789_v60 = vld [vmem:[%s6062_s4 + $0x98] sm:$0xff]  ;;  %v786_v63 = vld [vmem:[%s6062_s4 + $0x80] sm:$0xff] }
  0xfc   :  { %v145_v5 = vpop.f32.mrb[3].mxu0  ;;  %v151_v23 = vadd.f32 %v3142_v3, %v4584_v58  ;;  %v811_v62 = vpack.c.bf16 %v789_v60, %v787_v59  ;;  %v791_v3 = vld [vmem:[%s6062_s4 + $0xa8] sm:$0xff]  ;;  %v943_v60 = vld [vmem:[%s6063_s6 + $0x80] sm:$0xff] }
  0xfd   :  { %4298 = vtanh.f32 %v260_v0  ;;  %v146_v17 = vadd.f32 %v4584_v58, %v145_v5  ;;  %v788_v0 = vld [vmem:[%s6062_s4 + $0x90] sm:$0xff]  ;;  %v793_v5 = vld [vmem:[%s6062_s4 + $0xb8] sm:$0xff] }
  0xff   :  { %v4608_v6 = vpop.f32.mrb[4].mxu0 }
 0x100   :  { %v4610_v7 = vpop.f32.mrb[5].mxu0 }
 0x101   :  { %v156_v29 = vadd.f32 %v4584_v58, %v4610_v7  ;;  %v813_v7 = vpack.c.bf16 %v793_v5, %v791_v3  ;;  %v818_v3 = vld [vmem:[%s6064_s5] sm:$0x3] }
 0x103   :  { %v4612_v8 = vpop.f32.mrb[6].mxu0 }
 0x104   :  { %v4614_v10 = vpop.f32.mrb[7].mxu0 }
 0x107   :  { %v4587_v1 = vpop.eup %4298 }
 0x108   :  { %3217 = vmatmul.mubr.f32.vlgmr.msra.gmra.mrb[8].mxu0 %v4587_v1 }
 0x109   :  { %3535 = vmatpush3.bf16.msra.mxu0 %v4409_v9  ;;  %3286 = vmatprep.mubr.msk.f32.mxu0 %vm4325_vm0, %v6071_v4 }
 0x10a   :  { %3536 = vmatprep.subr.bf16.mxu0 %v4324_v2 }
 0x10d   :  { %3538 = vmatpush3.bf16.msra.mxu0 %v4424_v15 }
 0x10e   :  { %3539 = vmatprep.subr.bf16.mxu0 %v4324_v2 }
 0x111   :  { %3541 = vmatpush3.bf16.msra.mxu0 %v4440_v21 }
 0x112   :  { %3542 = vmatprep.subr.bf16.mxu0 %v4324_v2 }
 0x115   :  { %3544 = vmatpush3.bf16.msra.mxu0 %v4459_v28 }
 0x116   :  { %3545 = vmatprep.subr.bf16.mxu0 %v4324_v2 }
 0x119   :  { %3547 = vmatpush3.bf16.msra.mxu0 %v4475_v34 }
 0x11a   :  { %3548 = vmatprep.subr.bf16.mxu0 %v4324_v2 }
 0x11d   :  { %3550 = vmatpush3.bf16.msra.mxu0 %v4491_v40 }
 0x11e   :  { %3551 = vmatprep.subr.bf16.mxu0 %v4324_v2 }
 0x121   :  { %3553 = vmatpush3.bf16.msra.mxu0 %v4507_v46 }
 0x122   :  { %3554 = vmatprep.subr.bf16.mxu0 %v4324_v2 }
 0x125   :  { %3556 = vmatpush3.bf16.msra.mxu0 %v4517_v50 }
 0x126   :  { %3581 = vmatprep.subr.bf16.mxu0 %v4324_v2 }
 0x1db   :  { %v328_v12 = vpop.f32.mrb[8].mxu0 }
 0x1dc   :  { %v332_v13 = vadd.f32 %v328_v12, %v141_v11  ;;  %v3218_v14 = vpop.f32.mrb[9].mxu0  ;;  %v790_v11 = vld [vmem:[%s6062_s4 + $0xa0] sm:$0xff]  ;;  %v792_v12 = vld [vmem:[%s6062_s4 + $0xb0] sm:$0xff] }
 0x1dd   :  { %v797_v14 = vld [vmem:[%s6062_s4 + $0xd8] sm:$0xff] }
 0x1de   :  { %4300 = vtanh.f32 %v332_v13  ;;  %v795_v13 = vld [vmem:[%s6062_s4 + $0xc8] sm:$0xff] }
 0x1e8   :  { %v4617_v16 = vpop.eup %4300 }
 0x1e9   :  { %3252 = vmatmul.mubr.f32.vlgmr.msra.gmra.mrb[2].mxu1 %v4617_v16 }
 0x1ea   :  { %3559 = vmatpush3.bf16.msra.mxu1 %v4409_v9  ;;  %3321 = vmatprep.mubr.msk.f32.mxu1 %vm4325_vm0, %v6071_v4 }
 0x1eb   :  { %3560 = vmatprep.subr.bf16.mxu1 %v4324_v2 }
 0x1ee   :  { %3562 = vmatpush3.bf16.msra.mxu1 %v4424_v15 }
 0x1ef   :  { %3563 = vmatprep.subr.bf16.mxu1 %v4324_v2 }
 0x1f2   :  { %3565 = vmatpush3.bf16.msra.mxu1 %v4440_v21 }
 0x1f3   :  { %3566 = vmatprep.subr.bf16.mxu1 %v4324_v2 }
 0x1f6   :  { %3568 = vmatpush3.bf16.msra.mxu1 %v4459_v28 }
 0x1f7   :  { %3569 = vmatprep.subr.bf16.mxu1 %v4324_v2 }
 0x1fa   :  { %3571 = vmatpush3.bf16.msra.mxu1 %v4475_v34 }
 0x1fb   :  { %3572 = vmatprep.subr.bf16.mxu1 %v4324_v2 }
 0x1fe   :  { %3574 = vmatpush3.bf16.msra.mxu1 %v4491_v40 }
 0x1ff   :  { %3575 = vmatprep.subr.bf16.mxu1 %v4324_v2 }
 0x202   :  { %3577 = vmatpush3.bf16.msra.mxu1 %v4507_v46 }
 0x203   :  { %3578 = vmatprep.subr.bf16.mxu1 %v4324_v2 }
 0x206   :  { %3580 = vmatpush3.bf16.msra.mxu1 %v4517_v50 }
 0x207   :  { %3605 = vmatprep.subr.bf16.mxu1 %v4324_v2 }
 0x2bc   :  { %v400_v18 = vpop.f32.mrb[2].mxu1 }
 0x2bd   :  { %v404_v19 = vadd.f32 %v400_v18, %v146_v17  ;;  %v3253_v20 = vpop.f32.mrb[3].mxu1  ;;  %v812_v17 = vpack.c.bf16 %v792_v12, %v790_v11  ;;  %v815_v18 = vpack.c.bf16 %v797_v14, %v795_v13  ;;  %v947_v11 = vld [vmem:[%s6063_s6 + $0xa0] sm:$0xff]  ;;  %v949_v12 = vld [vmem:[%s6063_s6 + $0xb0] sm:$0xff]  ;;  %v952_v14 = vld [vmem:[%s6063_s6 + $0xc8] sm:$0xff] }
 0x2be   :  { %v796_v20 = vld [vmem:[%s6062_s4 + $0xd0] sm:$0xff] }
 0x2bf   :  { %4302 = vtanh.f32 %v404_v19  ;;  %v794_v19 = vld [vmem:[%s6062_s4 + $0xc0] sm:$0xff] }
 0x2c9   :  { %v4639_v22 = vpop.eup %4302 }
 0x2ca   :  { %3287 = vmatmul.mubr.f32.vlgmr.msra.gmra.mrb[10].mxu0 %v4639_v22 }
 0x2cb   :  { %3583 = vmatpush3.bf16.msra.mxu0 %v4409_v9  ;;  %3356 = vmatprep.mubr.msk.f32.mxu0 %vm4325_vm0, %v6071_v4 }
 0x2cc   :  { %3584 = vmatprep.subr.bf16.mxu0 %v4324_v2 }
 0x2cf   :  { %3586 = vmatpush3.bf16.msra.mxu0 %v4424_v15 }
 0x2d0   :  { %3587 = vmatprep.subr.bf16.mxu0 %v4324_v2 }
 0x2d3   :  { %3589 = vmatpush3.bf16.msra.mxu0 %v4440_v21 }
 0x2d4   :  { %3590 = vmatprep.subr.bf16.mxu0 %v4324_v2 }
 0x2d7   :  { %3592 = vmatpush3.bf16.msra.mxu0 %v4459_v28 }
 0x2d8   :  { %3593 = vmatprep.subr.bf16.mxu0 %v4324_v2 }
 0x2db   :  { %3595 = vmatpush3.bf16.msra.mxu0 %v4475_v34 }
 0x2dc   :  { %3596 = vmatprep.subr.bf16.mxu0 %v4324_v2 }
 0x2df   :  { %3598 = vmatpush3.bf16.msra.mxu0 %v4491_v40 }
 0x2e0   :  { %3599 = vmatprep.subr.bf16.mxu0 %v4324_v2 }
 0x2e3   :  { %3601 = vmatpush3.bf16.msra.mxu0 %v4507_v46 }
 0x2e4   :  { %3602 = vmatprep.subr.bf16.mxu0 %v4324_v2 }
 0x2e7   :  { %3604 = vmatpush3.bf16.msra.mxu0 %v4517_v50 }
 0x2e8   :  { %3629 = vmatprep.subr.bf16.mxu0 %v4324_v2 }
 0x39d   :  { %v472_v24 = vpop.f32.mrb[10].mxu0 }
 0x39e   :  { %v476_v25 = vadd.f32 %v472_v24, %v151_v23  ;;  %v3288_v26 = vpop.f32.mrb[11].mxu0  ;;  %v799_v23 = vld [vmem:[%s6062_s4 + $0xe8] sm:$0xff]  ;;  %v801_v24 = vld [vmem:[%s6062_s4 + $0xf8] sm:$0xff] }
 0x39f   :  { %v817_v26 = vpack.c.bf16 %v801_v24, %v799_v23  ;;  %v951_v24 = vld [vmem:[%s6063_s6 + $0xc0] sm:$0xff] }
 0x3a0   :  { %4304 = vtanh.f32 %v476_v25  ;;  %v814_v25 = vpack.c.bf16 %v796_v20, %v794_v19  ;;  %v4909_v19 = vpack.c.bf16 %v949_v12, %v947_v11 }
 0x3aa   :  { %v4661_v27 = vpop.eup %4304 }
 0x3ab   :  { %3322 = vmatmul.mubr.f32.vlgmr.msra.gmra.mrb[4].mxu1 %v4661_v27 }
 0x3ac   :  { %3607 = vmatpush3.bf16.msra.mxu1 %v4409_v9  ;;  %3391 = vmatprep.mubr.msk.f32.mxu1 %vm4325_vm0, %v6071_v4 }
 0x3ad   :  { %3608 = vmatprep.subr.bf16.mxu1 %v4324_v2 }
 0x3b0   :  { %3610 = vmatpush3.bf16.msra.mxu1 %v4424_v15 }
 0x3b1   :  { %3611 = vmatprep.subr.bf16.mxu1 %v4324_v2 }
 0x3b4   :  { %3613 = vmatpush3.bf16.msra.mxu1 %v4440_v21 }
 0x3b5   :  { %3614 = vmatprep.subr.bf16.mxu1 %v4324_v2 }
 0x3b8   :  { %3616 = vmatpush3.bf16.msra.mxu1 %v4459_v28 }
 0x3b9   :  { %3617 = vmatprep.subr.bf16.mxu1 %v4324_v2 }
 0x3bc   :  { %3619 = vmatpush3.bf16.msra.mxu1 %v4475_v34 }
 0x3bd   :  { %3620 = vmatprep.subr.bf16.mxu1 %v4324_v2 }
 0x3c0   :  { %3622 = vmatpush3.bf16.msra.mxu1 %v4491_v40 }
 0x3c1   :  { %3623 = vmatprep.subr.bf16.mxu1 %v4324_v2 }
 0x3c4   :  { %3625 = vmatpush3.bf16.msra.mxu1 %v4507_v46 }
 0x3c5   :  { %3626 = vmatprep.subr.bf16.mxu1 %v4324_v2 }
 0x3c8   :  { %3628 = vmatpush3.bf16.msra.mxu1 %v4517_v50 }
 0x47e   :  { %v544_v30 = vpop.f32.mrb[4].mxu1 }
 0x47f   :  { %v548_v31 = vadd.f32 %v544_v30, %v156_v29  ;;  %v3323_v32 = vpop.f32.mrb[5].mxu1  ;;  %v798_v29 = vld [vmem:[%s6062_s4 + $0xe0] sm:$0xff]  ;;  %v800_v30 = vld [vmem:[%s6062_s4 + $0xf0] sm:$0xff] }
 0x480   :  { %v766_v32 = vpack.c.bf16 %v4617_v16, %v4587_v1  ;;  %v930_v1 = vld [vmem:[%s6063_s6 + $0x18] sm:$0xff] }
 0x481   :  { %4306 = vtanh.f32 %v548_v31  ;;  %v816_v31 = vpack.c.bf16 %v800_v30, %v798_v29  ;;  %v956_v30 = vld [vmem:[%s6063_s6 + $0xe8] sm:$0xff] }
 0x48b   :  { %v4683_v33 = vpop.eup %4306 }
 0x48c   :  { %3357 = vmatmul.mubr.f32.vlgmr.msra.gmra.mrb[12].mxu0 %v4683_v33 }
 0x48d   :  { %3631 = vmatpush3.bf16.msra.mxu0 %v4409_v9  ;;  %3426 = vmatprep.mubr.msk.f32.mxu0 %vm4325_vm0, %v6071_v4  ;;  %v771_v9 = vld [vmem:[%s6062_s4 + $0x8] sm:$0xff] }
 0x48e   :  { %3632 = vmatprep.subr.bf16.mxu0 %v4324_v2 }
 0x491   :  { %3634 = vmatpush3.bf16.msra.mxu0 %v4424_v15  ;;  %v773_v15 = vld [vmem:[%s6062_s4 + $0x18] sm:$0xff] }
 0x492   :  { %3635 = vmatprep.subr.bf16.mxu0 %v4324_v2 }
 0x495   :  { %3637 = vmatpush3.bf16.msra.mxu0 %v4440_v21  ;;  %v803_v21 = vpack.c.bf16 %v773_v15, %v771_v9  ;;  %v767_v9 = vpack.c.bf16 %v4661_v27, %v4639_v22  ;;  %v166_v22 = vadd.f32 %v4584_v58, %v4614_v10  ;;  %v934_v10 = vld [vmem:[%s6063_s6 + $0x38] sm:$0xff] }
 0x496   :  { %3638 = vmatprep.subr.bf16.mxu0 %v4324_v2 }
 0x497   :  { %830 = vmatprep.subr.bf16.mxu1 %v803_v21  ;;  %v928_v21 = vld [vmem:[%s6063_s6 + $0x8] sm:$0xff] }
 0x498   :  { %v992_v16 = vpack.c.bf16 %v930_v1, %v928_v21 }
 0x499   :  { %3640 = vmatpush3.bf16.msra.mxu0 %v4459_v28  ;;  %v4327_v28 = vmov 0  }
 0x49a   :  { %3641 = vmatprep.subr.bf16.mxu0 %v4324_v2  ;;  %4297 = vset.pattern.permute.xlu0 %v4327_v28 }
 0x49d   :  { %3643 = vmatpush3.bf16.msra.mxu0 %v4475_v34  ;;  %v161_v34 = vadd.f32 %v4608_v6, %v4584_v58  ;;  %v810_v6 = vpack.c.bf16 %v788_v0, %v786_v63  ;;  %v948_v63 = vld [vmem:[%s6063_s6 + $0xa8] sm:$0xff]  ;;  %v950_v0 = vld [vmem:[%s6063_s6 + $0xb8] sm:$0xff] }
 0x49e   :  { %3644 = vmatprep.subr.bf16.mxu0 %v4324_v2 }
 0x4a1   :  { %3646 = vmatpush3.bf16.msra.mxu0 %v4491_v40  ;;  %v777_v40 = vld [vmem:[%s6062_s4 + $0x38] sm:$0xff] }
 0x4a2   :  { %3647 = vmatprep.subr.bf16.mxu0 %v4324_v2  ;;  %v805_v42 = vpack.c.bf16 %v777_v40, %v775_v39  ;;  %v933_v39 = vld [vmem:[%s6063_s6 + $0x30] sm:$0xff] }
 0x4a3   :  { %v993_v43 = vpack.c.bf16 %v933_v39, %v931_v38 }
 0x4a5   :  { %3649 = vmatpush3.bf16.msra.mxu0 %v4507_v46  ;;  %v779_v46 = vld [vmem:[%s6062_s4 + $0x48] sm:$0xff] }
 0x4a6   :  { %3650 = vmatprep.subr.bf16.mxu0 %v4324_v2  ;;  %v807_v49 = vpack.c.bf16 %v781_v47, %v779_v46  ;;  %v937_v46 = vld [vmem:[%s6063_s6 + $0x50] sm:$0xff]  ;;  %v940_v47 = vld [vmem:[%s6063_s6 + $0x68] sm:$0xff] }
 0x4a9   :  { %3652 = vmatpush3.bf16.msra.mxu0 %v4517_v50  ;;  %v778_v50 = vld [vmem:[%s6062_s4 + $0x40] sm:$0xff] }
 0x4aa   :  { %v806_v54 = vpack.c.bf16 %v780_v51, %v778_v50  ;;  %1035 = vmatprep.subr.bf16.mxu0 %v992_v16 }
 0x55f   :  { %v616_v35 = vpop.f32.mrb[12].mxu0 }
 0x560   :  { %v620_v2 = vadd.f32 %v616_v35, %v161_v34  ;;  %v3358_v36 = vpop.f32.mrb[13].mxu0 }
 0x562   :  { %4308 = vtanh.f32 %v620_v2  ;;  %v932_v2 = vld [vmem:[%s6063_s6 + $0x28] sm:$0xff] }
 0x563   :  { %v994_v37 = vpack.c.bf16 %v934_v10, %v932_v2  ;;  %v962_v2 = vld [vmem:[%s6063_s6 + $0x118] sm:$0xff] }
 0x56c   :  { %v4309_v45 = vpop.eup %4308 }
 0x56d   :  { %3392 = vmatmul.mubr.f32.vlgmr.msra.gmra.mrb[6].mxu1 %v4309_v45  ;;  %v768_v15 = vpack.c.bf16 %v4309_v45, %v4683_v33  ;;  %v927_v33 = vld [vmem:[%s6063_s6] sm:$0xff] }
 0x56e   :  { %831 = vmatpush1.bf16.msra.mxu1 %v802_v41  ;;  %862 = vmatprep.mubr.bf16.mxu1 %v4327_v28  ;;  %v936_v41 = vld [vmem:[%s6063_s6 + $0x48] sm:$0xff]  ;;  %v935_v45 = vld [vmem:[%s6063_s6 + $0x40] sm:$0xff] }
 0x56f   :  { %832 = vmatprep.subr.bf16.mxu1 %v805_v42  ;;  %v938_v42 = vld [vmem:[%s6063_s6 + $0x58] sm:$0xff]  ;;  %v995_v50 = vpack.c.bf16 %v937_v46, %v935_v45 }
 0x570   :  { %v996_v44 = vpack.c.bf16 %v938_v42, %v936_v41 }
 0x572   :  { %833 = vmatpush1.bf16.msra.mxu1 %v804_v48  ;;  %v942_v48 = vld [vmem:[%s6063_s6 + $0x78] sm:$0xff] }
 0x573   :  { %834 = vmatprep.subr.bf16.mxu1 %v807_v49  ;;  %v820_v49 = vlaneseq  ;;  %v998_v51 = vpack.c.bf16 %v942_v48, %v940_v47  ;;  %v964_v47 = vld [vmem:[%s6063_s6 + $0x128] sm:$0xff]  ;;  %v966_v48 = vld [vmem:[%s6063_s6 + $0x138] sm:$0xff] }
 0x575   :  { %v821_v56 = vshrl.u32 %v820_v49, 7 }
 0x576   :  { %835 = vmatpush1.bf16.msra.mxu1 %v806_v54  ;;  %v944_v54 = vld [vmem:[%s6063_s6 + $0x88] sm:$0xff] }
 0x577   :  { %836 = vmatprep.subr.bf16.mxu1 %v809_v55  ;;  %v946_v55 = vld [vmem:[%s6063_s6 + $0x98] sm:$0xff]  ;;  %v4887_v5 = vsub.s32 1, %v821_v56 }
 0x578   :  { %v1000_v59 = vpack.c.bf16 %v946_v55, %v944_v54  ;;  %v4976_v55 = vpack.c.bf16 %v966_v48, %v964_v47  ;;  %v977_v47 = vld [vmem:[%s6063_s6 + $0x190] sm:$0xff]  ;;  %v980_v48 = vld [vmem:[%s6063_s6 + $0x1a8] sm:$0xff] }
 0x57a   :  { %837 = vmatpush1.bf16.msra.mxu1 %v808_v61  ;;  %v945_v61 = vld [vmem:[%s6063_s6 + $0x90] sm:$0xff] }
 0x57b   :  { %838 = vmatprep.subr.bf16.mxu1 %v811_v62  ;;  %v4876_v62 = vsub.s32 0, %v821_v56  ;;  %v963_v56 = vld [vmem:[%s6063_s6 + $0x120] sm:$0xff] }
 0x57d   :  { %v4898_v13 = vrot.slane %v818_v3, %v4876_v62 }
 0x57e   :  { %839 = vmatpush1.bf16.msra.mxu1 %v810_v6  ;;  %v999_v6 = vpack.c.bf16 %v945_v61, %v943_v60  ;;  %v968_v61 = vld [vmem:[%s6063_s6 + $0x148] sm:$0xff] }
 0x57f   :  { %840 = vmatprep.subr.bf16.mxu1 %v813_v7  ;;  %v4889_v7 = vpack.c.bf16 %v950_v0, %v948_v63  ;;  %v970_v63 = vld [vmem:[%s6063_s6 + $0x158] sm:$0xff] }
 0x582   :  { %841 = vmatpush1.bf16.msra.mxu1 %v812_v17  ;;  %v954_v17 = vld [vmem:[%s6063_s6 + $0xd8] sm:$0xff] }
 0x583   :  { %842 = vmatprep.subr.bf16.mxu1 %v815_v18  ;;  %v4907_v18 = vrot.slane %v818_v3, %v4887_v5  ;;  %v4912_v23 = vpack.c.bf16 %v954_v17, %v952_v14  ;;  %v4998_v17 = vpack.c.bf16 %v970_v63, %v968_v61  ;;  %v983_v61 = vld [vmem:[%s6063_s6 + $0x1c0] sm:$0xff]  ;;  %v985_v63 = vld [vmem:[%s6063_s6 + $0x1d0] sm:$0xff] }
 0x586   :  { %843 = vmatpush1.bf16.msra.mxu1 %v814_v25  ;;  %v953_v25 = vld [vmem:[%s6063_s6 + $0xd0] sm:$0xff] }
 0x587   :  { %844 = vmatprep.subr.bf16.mxu1 %v817_v26  ;;  %v4930_v1 = vpack.c.bf16 %v953_v25, %v951_v24  ;;  %v969_v24 = vld [vmem:[%s6063_s6 + $0x150] sm:$0xff] }
 0x58a   :  { %845 = vmatpush1.bf16.msra.mxu1 %v816_v31  ;;  %v958_v31 = vld [vmem:[%s6063_s6 + $0xf8] sm:$0xff] }
 0x58d   :  { %863 = vmatmul.mubr.bf16.vlgmr.msra.gmra.mrb[8].mxu1 %v766_v32 }
 0x58e   :  { %872 = vmatprep.mubr.bf16.mxu1 %v4327_v28 }
 0x595   :  { %873 = vmatmul.mubr.bf16.gmra.mrb[12].mxu1 %v767_v9 }
 0x596   :  { %882 = vmatprep.mubr.bf16.mxu1 %v4327_v28 }
 0x59d   :  { %883 = vmatmul.mubr.bf16.gmra.mrb[16].mxu1 %v768_v15 }
 0x59e   :  { %892 = vmatprep.mubr.bf16.mxu1 %v4327_v28  ;;  %v929_v28 = vld [vmem:[%s6063_s6 + $0x10] sm:$0xff] }
 0x59f   :  { %v991_v36 = vpack.c.bf16 %v929_v28, %v927_v33  ;;  %v960_v28 = vld [vmem:[%s6063_s6 + $0x108] sm:$0xff] }
 0x5a0   :  { %v4954_v42 = vpack.c.bf16 %v962_v2, %v960_v28  ;;  %v976_v2 = vld [vmem:[%s6063_s6 + $0x188] sm:$0xff] }
 0x640   :  { %v688_v27 = vpop.f32.mrb[6].mxu1 }
 0x641   :  { %v692_v34 = vadd.f32 %v688_v27, %v166_v22  ;;  %v3393_v35 = vpop.f32.mrb[7].mxu1  ;;  %v4934_v22 = vpack.c.bf16 %v958_v31, %v956_v30  ;;  %v955_v27 = vld [vmem:[%s6063_s6 + $0xe0] sm:$0xff]  ;;  %v974_v30 = vld [vmem:[%s6063_s6 + $0x178] sm:$0xff] }
 0x643   :  { %4310 = vtanh.f32 %v692_v34  ;;  %v957_v34 = vld [vmem:[%s6063_s6 + $0xf0] sm:$0xff] }
 0x644   :  { %v4951_v38 = vpack.c.bf16 %v957_v34, %v955_v27  ;;  %v971_v34 = vld [vmem:[%s6063_s6 + $0x160] sm:$0xff] }
 0x64d   :  { %v4837_v40 = vpop.eup %4310 }
 0x64e   :  { %3427 = vmatmul.mubr.f32.vlgmr.msra.gmra.mrb[14].mxu0 %v4837_v40 }
 0x64f   :  { %1036 = vmatpush1.bf16.msra.mxu0 %v991_v36 }
 0x650   :  { %1037 = vmatprep.subr.bf16.mxu0 %v994_v37 }
 0x653   :  { %1038 = vmatpush1.bf16.msra.mxu0 %v993_v43  ;;  %v959_v43 = vld [vmem:[%s6063_s6 + $0x100] sm:$0xff] }
 0x654   :  { %1039 = vmatprep.subr.bf16.mxu0 %v996_v44  ;;  %v961_v44 = vld [vmem:[%s6063_s6 + $0x110] sm:$0xff] }
 0x655   :  { %v4972_v53 = vpack.c.bf16 %v961_v44, %v959_v43 }
 0x657   :  { %1040 = vmatpush1.bf16.msra.mxu0 %v995_v50 }
 0x658   :  { %1041 = vmatprep.subr.bf16.mxu0 %v998_v51 }
 0x65b   :  { %1042 = vmatpush1.bf16.msra.mxu0 %v997_v57  ;;  %v965_v57 = vld [vmem:[%s6063_s6 + $0x130] sm:$0xff] }
 0x65c   :  { %1043 = vmatprep.subr.bf16.mxu0 %v1000_v59  ;;  %v4993_v11 = vpack.c.bf16 %v965_v57, %v963_v56  ;;  %v984_v56 = vld [vmem:[%s6063_s6 + $0x1c8] sm:$0xff]  ;;  %v986_v57 = vld [vmem:[%s6063_s6 + $0x1d8] sm:$0xff] }
 0x65f   :  { %1044 = vmatpush1.bf16.msra.mxu0 %v999_v6 }
 0x660   :  { %v864_v20 = vpop.f32.mrb[8].mxu1  ;;  %1045 = vmatprep.subr.bf16.mxu0 %v4889_v7 }
 0x661   :  { %v865_v26 = vadd.f32 %v864_v20, %v4898_v13  ;;  %v866_v29 = vpop.f32.mrb[9].mxu1  ;;  %v967_v20 = vld [vmem:[%s6063_s6 + $0x140] sm:$0xff] }
 0x662   :  { %v867_v32 = vadd.f32 %v866_v29, %v4907_v18  ;;  %v868_v9 = vpop.f32.mrb[10].mxu1  ;;  %v972_v29 = vld [vmem:[%s6063_s6 + $0x168] sm:$0xff] }
 0x663   :  { %v869_v15 = vadd.f32 %v868_v9, %v4898_v13  ;;  %v870_v21 = vpop.f32.mrb[11].mxu1  ;;  %1046 = vmatpush1.bf16.msra.mxu0 %v4909_v19  ;;  %v903_v35 = vmax.f32 %v865_v26, 0.0  ;;  %v5020_v27 = vpack.c.bf16 %v974_v30, %v972_v29  ;;  %v1148_v29 = vld [vmem:[%s6065_s8 + $0x80] sm:$0xff]  ;;  %v1149_v30 = vld [vmem:[%s6065_s8 + $0x88] sm:$0xff] }
 0x664   :  { %v871_v16 = vadd.f32 %v870_v21, %v4907_v18  ;;  %1047 = vmatprep.subr.bf16.mxu0 %v4912_v23  ;;  %v904_v10 = vmax.f32 %v867_v32, 0.0  ;;  %v5016_v21 = vpack.c.bf16 %v969_v24, %v967_v20  ;;  %v987_v24 = vld [vmem:[%s6063_s6 + $0x1e0] sm:$0xff] }
 0x665   :  { %v905_v33 = vmax.f32 %v869_v15, 0.0 }
 0x666   :  { %v906_v36 = vmax.f32 %v871_v16, 0.0 }
 0x667   :  { %v4948_v37 = vpack.c.bf16 %v905_v33, %v903_v35  ;;  %1048 = vmatpush1.bf16.msra.mxu0 %v4930_v1  ;;  %v973_v35 = vld [vmem:[%s6063_s6 + $0x170] sm:$0xff] }
 0x668   :  { %v920_v39 = vpack.c.bf16 %v906_v36, %v904_v10  ;;  %v874_v41 = vpop.f32.mrb[12].mxu1  ;;  %1049 = vmatprep.subr.bf16.mxu0 %v4934_v22  ;;  %v978_v10 = vld [vmem:[%s6063_s6 + $0x198] sm:$0xff]  ;;  %v5035_v43 = vpack.c.bf16 %v973_v35, %v971_v34  ;;  %v1152_v35 = vld [vmem:[%s6065_s8 + $0xa0] sm:$0xff] }
 0x669   :  { %v875_v45 = vadd.f32 %v874_v41, %v4898_v13  ;;  %v876_v46 = vpop.f32.mrb[13].mxu1  ;;  %v1135_v34 = vld [vmem:[%s6065_s8 + $0x18] sm:$0xff] }
 0x66a   :  { %v877_v49 = vadd.f32 %v876_v46, %v4907_v18  ;;  %v878_v50 = vpop.f32.mrb[14].mxu1  ;;  %1067 = vmatprep.mubr.bf16.mxu0 %v920_v39  ;;  %v975_v46 = vld [vmem:[%s6063_s6 + $0x180] sm:$0xff] }
 0x66b   :  { %v879_v51 = vadd.f32 %v878_v50, %v4898_v13  ;;  %v880_v52 = vpop.f32.mrb[15].mxu1  ;;  %1050 = vmatpush1.bf16.msra.mxu0 %v4951_v38  ;;  %v907_v59 = vmax.f32 %v875_v45, 0.0  ;;  %v5038_v45 = vpack.c.bf16 %v978_v10, %v976_v2  ;;  %v5053_v50 = vpack.c.bf16 %v977_v47, %v975_v46  ;;  %v1136_v10 = vld [vmem:[%s6065_s8 + $0x20] sm:$0xff]  ;;  %v1138_v47 = vld [vmem:[%s6065_s8 + $0x30] sm:$0xff] }
 0x66c   :  { %v881_v54 = vadd.f32 %v880_v52, %v4907_v18  ;;  %1051 = vmatprep.subr.bf16.mxu0 %v4954_v42  ;;  %v908_v0 = vmax.f32 %v877_v49, 0.0  ;;  %v982_v49 = vld [vmem:[%s6063_s6 + $0x1b8] sm:$0xff]  ;;  %v979_v52 = vld [vmem:[%s6063_s6 + $0x1a0] sm:$0xff] }
 0x66d   :  { %v909_v60 = vmax.f32 %v879_v51, 0.0  ;;  %6178 = vst [vmem:[#allocation2_spill] sm:$0xff] %v5038_v45  ;;  %6179 = vst [vmem:[#allocation3_spill] sm:$0xff] %v5053_v50  ;;  %v5056_v51 = vpack.c.bf16 %v982_v49, %v980_v48  ;;  %v1139_v48 = vld [vmem:[%s6065_s8 + $0x38] sm:$0xff]  ;;  %v1156_v49 = vld [vmem:[%s6065_s8 + $0xc0] sm:$0xff] }
 0x66e   :  { %v910_v3 = vmax.f32 %v881_v54, 0.0  ;;  %v981_v54 = vld [vmem:[%s6063_s6 + $0x1b0] sm:$0xff] }
 0x66f   :  { %v4990_v6 = vpack.c.bf16 %v909_v60, %v907_v59  ;;  %1052 = vmatpush1.bf16.msra.mxu0 %v4972_v53  ;;  %v5071_v59 = vpack.c.bf16 %v981_v54, %v979_v52  ;;  %v5074_v60 = vpack.c.bf16 %v986_v57, %v984_v56  ;;  %v1157_v52 = vld [vmem:[%s6065_s8 + $0xc8] sm:$0xff]  ;;  %v5182_v54 = vpack.c.bf16 %v1139_v48, %v1138_v47  ;;  %v1140_v57 = vld [vmem:[%s6065_s8 + $0x40] sm:$0xff] }
 0x670   :  { %v4995_v12 = vpack.c.bf16 %v910_v3, %v908_v0  ;;  %v884_v14 = vpop.f32.mrb[16].mxu1  ;;  %1053 = vmatprep.subr.bf16.mxu0 %v4976_v55  ;;  %v988_v0 = vld [vmem:[%s6063_s6 + $0x1e8] sm:$0xff]  ;;  %v990_v3 = vld [vmem:[%s6063_s6 + $0x1f8] sm:$0xff]  ;;  %v5185_v56 = vpack.c.bf16 %v1157_v52, %v1156_v49  ;;  %v171_v47 = vadd.f32 %v4612_v8, %v4584_v58 }
 0x671   :  { %v885_v25 = vadd.f32 %v884_v14, %v4898_v13  ;;  %v886_v26 = vpop.f32.mrb[17].mxu1  ;;  %v5089_v14 = vpack.c.bf16 %v985_v63, %v983_v61  ;;  %v5092_v20 = vpack.c.bf16 %v990_v3, %v988_v0  ;;  %6187 = vst [vmem:[#allocation11_spill] sm:$0xff] %v5182_v54  ;;  %v1141_v61 = vld [vmem:[%s6065_s8 + $0x48] sm:$0xff]  ;;  %v1158_v63 = vld [vmem:[%s6065_s8 + $0xd0] sm:$0xff]  ;;  %v1159_v0 = vld [vmem:[%s6065_s8 + $0xd8] sm:$0xff] }
 0x672   :  { %v887_v31 = vadd.f32 %v886_v26, %v4907_v18  ;;  %v888_v32 = vpop.f32.mrb[18].mxu1  ;;  %6188 = vst [vmem:[#allocation12_spill] sm:$0xff] %v5185_v56  ;;  %v5200_v3 = vpack.c.bf16 %v1141_v61, %v1140_v57 }
 0x673   :  { %v889_v9 = vadd.f32 %v888_v32, %v4898_v13  ;;  %v890_v15 = vpop.f32.mrb[19].mxu1  ;;  %1054 = vmatpush1.bf16.msra.mxu0 %v4993_v11  ;;  %v911_v33 = vmax.f32 %v885_v25, 0.0  ;;  %6180 = vst [vmem:[#allocation4_spill] sm:$0xff] %v5089_v14  ;;  %6181 = vst [vmem:[#allocation5_spill] sm:$0xff] %v5092_v20  ;;  %v989_v25 = vld [vmem:[%s6063_s6 + $0x1f0] sm:$0xff]  ;;  %v5117_v32 = vpack.c.bf16 %v1149_v30, %v1148_v29  ;;  %v1143_v29 = vld [vmem:[%s6065_s8 + $0x58] sm:$0xff] }
 0x674   :  { %v891_v16 = vadd.f32 %v890_v15, %v4907_v18  ;;  %1055 = vmatprep.subr.bf16.mxu0 %v4998_v17  ;;  %v912_v36 = vmax.f32 %v887_v31, 0.0  ;;  %v5101_v26 = vpack.c.bf16 %v989_v25, %v987_v24  ;;  %v1132_v31 = vld [vmem:[%s6065_s8] sm:$0xff]  ;;  %6189 = vst [vmem:[#allocation13_spill] sm:$0xff] %v5200_v3  ;;  %v5203_v24 = vpack.c.bf16 %v1159_v0, %v1158_v63  ;;  %v1142_v25 = vld [vmem:[%s6065_s8 + $0x50] sm:$0xff] }
 0x675   :  { %v913_v28 = vmax.f32 %v889_v9, 0.0  ;;  %6183 = vst [vmem:[#allocation7_spill] sm:$0xff] %v5117_v32  ;;  %2785 = vmatprep.subr.bf16.mxu1 %v5117_v32  ;;  %v5213_v30 = vpack.c.bf16 %v1143_v29, %v1142_v25  ;;  %v1023_v63 = vld [vmem:[%s6066_s7] sm:$0x3] }
 0x676   :  { %v914_v39 = vmax.f32 %v891_v16, 0.0  ;;  %6182 = vst [vmem:[#allocation6_spill] sm:$0xff] %v5101_v26  ;;  %v1134_v16 = vld [vmem:[%s6065_s8 + $0x10] sm:$0xff]  ;;  %6190 = vst [vmem:[#allocation14_spill] sm:$0xff] %v5203_v24  ;;  %v5262_v0 = vrot.slane %v1023_v63, %v4876_v62  ;;  %v5265_v25 = vrot.slane %v1023_v63, %v4887_v5 }
 0x677   :  { %v923_v41 = vpack.c.bf16 %v913_v28, %v911_v33  ;;  %1056 = vmatpush1.bf16.msra.mxu0 %v5016_v21  ;;  %v1153_v33 = vld [vmem:[%s6065_s8 + $0xa8] sm:$0xff]  ;;  %v5146_v28 = vpack.c.bf16 %v1135_v34, %v1134_v16  ;;  %6191 = vst [vmem:[#allocation15_spill] sm:$0xff] %v5213_v30 }
 0x678   :  { %v924_v44 = vpack.c.bf16 %v914_v39, %v912_v36  ;;  %1057 = vmatprep.subr.bf16.mxu0 %v5020_v27  ;;  %v5149_v2 = vpack.c.bf16 %v1153_v33, %v1152_v35  ;;  %v1137_v36 = vld [vmem:[%s6065_s8 + $0x28] sm:$0xff]  ;;  %v1154_v39 = vld [vmem:[%s6065_s8 + $0xb0] sm:$0xff]  ;;  %v1163_v33 = vld [vmem:[%s6065_s8 + $0xf8] sm:$0xff] }
 0x679   :  { %v1145_v16 = vld [vmem:[%s6065_s8 + $0x68] sm:$0xff]  ;;  %v1162_v35 = vld [vmem:[%s6065_s8 + $0xf0] sm:$0xff] }
 0x67a   :  { %6184 = vst [vmem:[#allocation8_spill] sm:$0xff] %v5149_v2 }
 0x67b   :  { %1058 = vmatpush1.bf16.msra.mxu0 %v5035_v43 }
 0x67c   :  { %1059 = vmatprep.subr.bf16.mxu0 %v5038_v45 }
 0x67f   :  { %1060 = vmatpush1.bf16.msra.mxu0 %v5053_v50 }
 0x680   :  { %1061 = vmatprep.subr.bf16.mxu0 %v5056_v51 }
 0x683   :  { %1062 = vmatpush1.bf16.msra.mxu0 %v5071_v59 }
 0x684   :  { %1063 = vmatprep.subr.bf16.mxu0 %v5074_v60 }
 0x687   :  { %1064 = vmatpush1.bf16.msra.mxu0 %v5089_v14 }
 0x688   :  { %1065 = vmatprep.subr.bf16.mxu0 %v5092_v20 }
 0x68b   :  { %1066 = vmatpush1.bf16.msra.mxu0 %v5101_v26 }
 0x68e   :  { %1068 = vmatmul.mubr.bf16.vlgmr.msra.gmra.mrb[16].mxu0 %v4948_v37  ;;  %v1133_v37 = vld [vmem:[%s6065_s8 + $0x8] sm:$0xff] }
 0x68f   :  { %1077 = vmatprep.mubr.bf16.mxu0 %v4995_v12  ;;  %v1151_v12 = vld [vmem:[%s6065_s8 + $0x98] sm:$0xff]  ;;  %v5128_v9 = vpack.c.bf16 %v1133_v37, %v1132_v31  ;;  %v1160_v31 = vld [vmem:[%s6065_s8 + $0xe0] sm:$0xff]  ;;  %v1161_v37 = vld [vmem:[%s6065_s8 + $0xe8] sm:$0xff] }
 0x691   :  { %2786 = vmatpush3.bf16.msra.mxu1 %v5128_v9 }
 0x696   :  { %1078 = vmatmul.mubr.bf16.gmra.mrb[20].mxu0 %v4990_v6  ;;  %v1150_v6 = vld [vmem:[%s6065_s8 + $0x90] sm:$0xff] }
 0x697   :  { %1087 = vmatprep.mubr.bf16.mxu0 %v924_v44  ;;  %v5130_v15 = vpack.c.bf16 %v1151_v12, %v1150_v6  ;;  %v5164_v44 = vpack.c.bf16 %v1137_v36, %v1136_v10  ;;  %v5222_v6 = vpack.c.bf16 %v1161_v37, %v1160_v31  ;;  %v1144_v12 = vld [vmem:[%s6065_s8 + $0x60] sm:$0xff]  ;;  %v5240_v10 = vpack.c.bf16 %v1163_v33, %v1162_v35  ;;  %v1146_v36 = vld [vmem:[%s6065_s8 + $0x70] sm:$0xff] }
 0x698   :  { %v5230_v34 = vpack.c.bf16 %v1145_v16, %v1144_v12 }
 0x699   :  { %2787 = vmatprep.subr.bf16.mxu1 %v5130_v15  ;;  %6185 = vst [vmem:[#allocation9_spill] sm:$0xff] %v5164_v44  ;;  %6192 = vst [vmem:[#allocation16_spill] sm:$0xff] %v5222_v6 }
 0x69a   :  { %2788 = vmatpush3.bf16.msra.mxu1 %v5146_v28  ;;  %6193 = vst [vmem:[#allocation17_spill] sm:$0xff] %v5230_v34  ;;  %6194 = vst [vmem:[#allocation18_spill] sm:$0xff] %v5240_v10 }
 0x69b   :  { %2789 = vmatprep.subr.bf16.mxu1 %v5149_v2 }
 0x69e   :  { %1088 = vmatmul.mubr.bf16.gmra.mrb[24].mxu0 %v923_v41  ;;  %v1155_v41 = vld [vmem:[%s6065_s8 + $0xb8] sm:$0xff]  ;;  %2790 = vmatpush3.bf16.msra.mxu1 %v5164_v44 }
 0x69f   :  { %v5167_v46 = vpack.c.bf16 %v1155_v41, %v1154_v39  ;;  %v1147_v39 = vld [vmem:[%s6065_s8 + $0x78] sm:$0xff] }
 0x6a0   :  { %v5248_v41 = vpack.c.bf16 %v1147_v39, %v1146_v36 }
 0x6a1   :  { %6186 = vst [vmem:[#allocation10_spill] sm:$0xff] %v5167_v46  ;;  %2791 = vmatprep.subr.bf16.mxu1 %v5167_v46 }
 0x6a2   :  { %2792 = vmatpush3.bf16.msra.mxu1 %v5182_v54  ;;  %6195 = vst [vmem:[#allocation19_spill] sm:$0xff] %v5248_v41 }
 0x6a3   :  { %2793 = vmatprep.subr.bf16.mxu1 %v5185_v56 }
 0x6a6   :  { %2794 = vmatpush3.bf16.msra.mxu1 %v5200_v3 }
 0x6a7   :  { %2795 = vmatprep.subr.bf16.mxu1 %v5203_v24 }
 0x6aa   :  { %2796 = vmatpush3.bf16.msra.mxu1 %v5213_v30 }
 0x6ab   :  { %2797 = vmatprep.subr.bf16.mxu1 %v5222_v6 }
 0x6ae   :  { %2798 = vmatpush3.bf16.msra.mxu1 %v5230_v34 }
 0x6af   :  { %2799 = vmatprep.subr.bf16.mxu1 %v5240_v10 }
 0x6b2   :  { %2800 = vmatpush3.bf16.msra.mxu1 %v5248_v41 }
 0x721   :  { %v760_v48 = vpop.f32.mrb[14].mxu0 }
 0x722   :  { %v764_v49 = vadd.f32 %v760_v48, %v171_v47  ;;  %v3428_v52 = vpop.f32.mrb[15].mxu0 }
 0x724   :  { %4312 = vtanh.f32 %v764_v49 }
 0x72e   :  { %v5254_v57 = vpop.eup %4312 }
 0x72f   :  { %v769_v61 = vpack.c.bf16 %v5254_v57, %v4837_v40 }
 0x731   :  { %893 = vmatmul.mubr.bf16.gmra.mrb[20].mxu1 %v769_v61 }
 0x761   :  { %v1069_v58 = vpop.f32.mrb[16].mxu0 }
 0x762   :  { %v1070_v8 = vadd.f32 %v1069_v58, %v5262_v0  ;;  %v1071_v29 = vpop.f32.mrb[17].mxu0 }
 0x763   :  { %v1072_v31 = vadd.f32 %v1071_v29, %v5265_v25  ;;  %v1073_v37 = vpop.f32.mrb[18].mxu0 }
 0x764   :  { %v1074_v40 = vadd.f32 %v1073_v37, %v5262_v0  ;;  %v1075_v12 = vpop.f32.mrb[19].mxu0  ;;  %v1108_v35 = vmax.f32 %v1070_v8, 0.0 }
 0x765   :  { %v1076_v16 = vadd.f32 %v1075_v12, %v5265_v25  ;;  %v1109_v36 = vmax.f32 %v1072_v31, 0.0 }
 0x766   :  { %v1110_v33 = vmax.f32 %v1074_v40, 0.0 }
 0x767   :  { %v1111_v39 = vmax.f32 %v1076_v16, 0.0 }
 0x768   :  { %v1124_v47 = vpack.c.bf16 %v1110_v33, %v1108_v35 }
 0x769   :  { %v1125_v48 = vpack.c.bf16 %v1111_v39, %v1109_v36  ;;  %v1079_v49 = vpop.f32.mrb[20].mxu0 }
 0x76a   :  { %v1080_v52 = vadd.f32 %v1079_v49, %v5262_v0  ;;  %v1081_v61 = vpop.f32.mrb[21].mxu0 }
 0x76b   :  { %v1082_v63 = vadd.f32 %v1081_v61, %v5265_v25  ;;  %v1083_v58 = vpop.f32.mrb[22].mxu0  ;;  %1219 = vmatprep.mubr.bf16.mxu1 %v1125_v48 }
 0x76c   :  { %v1084_v29 = vadd.f32 %v1083_v58, %v5262_v0  ;;  %v1085_v37 = vpop.f32.mrb[23].mxu0  ;;  %1220 = vmatmul.mubr.bf16.vlgmr.msra.gmra.mrb[24].mxu1 %v1124_v47  ;;  %v1112_v8 = vmax.f32 %v1080_v52, 0.0 }
 0x76d   :  { %v1086_v12 = vadd.f32 %v1085_v37, %v5265_v25  ;;  %v1113_v31 = vmax.f32 %v1082_v63, 0.0 }
 0x76e   :  { %v1114_v40 = vmax.f32 %v1084_v29, 0.0 }
 0x76f   :  { %v1115_v16 = vmax.f32 %v1086_v12, 0.0 }
 0x770   :  { %v1126_v35 = vpack.c.bf16 %v1114_v40, %v1112_v8 }
 0x771   :  { %v1127_v33 = vpack.c.bf16 %v1115_v16, %v1113_v31  ;;  %v1089_v36 = vpop.f32.mrb[24].mxu0 }
 0x772   :  { %v1090_v39 = vadd.f32 %v1089_v36, %v5262_v0  ;;  %v1091_v49 = vpop.f32.mrb[25].mxu0 }
 0x773   :  { %v1092_v61 = vadd.f32 %v1091_v49, %v5265_v25  ;;  %v1093_v4 = vpop.f32.mrb[26].mxu0  ;;  %1227 = vmatprep.mubr.bf16.mxu1 %v1127_v33 }
 0x774   :  { %v1094_v48 = vadd.f32 %v1093_v4, %v5262_v0  ;;  %v1095_v58 = vpop.f32.mrb[27].mxu0  ;;  %1228 = vmatmul.mubr.bf16.gmra.mrb[28].mxu1 %v1126_v35  ;;  %v1116_v52 = vmax.f32 %v1090_v39, 0.0 }
 0x775   :  { %v1096_v47 = vadd.f32 %v1095_v58, %v5265_v25  ;;  %v1117_v63 = vmax.f32 %v1092_v61, 0.0 }
 0x776   :  { %v1118_v29 = vmax.f32 %v1094_v48, 0.0 }
 0x777   :  { %v1119_v37 = vmax.f32 %v1096_v47, 0.0 }
 0x778   :  { %v1128_v12 = vpack.c.bf16 %v1118_v29, %v1116_v52  ;;  %v6196_v29 = vmov 0.0  }
 0x779   :  { %v1129_v8 = vpack.c.bf16 %v1119_v37, %v1117_v63  ;;  %v5287_v37 = vld [vmem:[%s6067_s9] ss:$0 sm:$0xff] }
 0x77a   :  { %6197 = vst [vmem:[#allocation20_spill] sm:$0xff] %v5287_v37 }
 0x77b   :  { %1235 = vmatprep.mubr.bf16.mxu1 %v1129_v8 }
 0x77c   :  { %1236 = vmatmul.mubr.bf16.gmra.mrb[32].mxu1 %v1128_v12 }
 0x804   :  { %v894_v40 = vpop.f32.mrb[20].mxu1 }
 0x805   :  { %v895_v31 = vadd.f32 %v894_v40, %v4898_v13  ;;  %v896_v16 = vpop.f32.mrb[21].mxu1 }
 0x806   :  { %v897_v33 = vadd.f32 %v896_v16, %v4907_v18  ;;  %v898_v36 = vpop.f32.mrb[22].mxu1 }
 0x807   :  { %v899_v4 = vadd.f32 %v898_v36, %v4898_v13  ;;  %v900_v35 = vpop.f32.mrb[23].mxu1  ;;  %v915_v39 = vmax.f32 %v895_v31, 0.0 }
 0x808   :  { %v901_v49 = vadd.f32 %v900_v35, %v4907_v18  ;;  %v916_v61 = vmax.f32 %v897_v33, 0.0 }
 0x809   :  { %v917_v48 = vmax.f32 %v899_v4, 0.0 }
 0x80a   :  { %v918_v58 = vmax.f32 %v901_v49, 0.0 }
 0x80b   :  { %v925_v47 = vpack.c.bf16 %v917_v48, %v915_v39 }
 0x80c   :  { %v926_v52 = vpack.c.bf16 %v918_v58, %v916_v61 }
 0x80e   :  { %1097 = vmatprep.mubr.bf16.mxu0 %v926_v52 }
 0x80f   :  { %1098 = vmatmul.mubr.bf16.gmra.mrb[28].mxu0 %v925_v47 }
 0x810   :  { %1476 = vmatprep.mubr.f32.mxu0 %v6196_v29 }
 0x83f   :  { %v2801_v63 = vpop.f32.mrb[24].mxu1 }
 0x840   :  { %v2802_v13 = vpop.f32.mrb[25].mxu1 }
 0x841   :  { %v2803_v12 = vadd.f32 %v2802_v13, %v2801_v63  ;;  %v2804_v8 = vpop.f32.mrb[26].mxu1 }
 0x842   :  { %v2805_v18 = vpop.f32.mrb[27].mxu1 }
 0x843   :  { %v1222_v40 = vadd.f32 %v2803_v12, %v5287_v37  ;;  %v2806_v31 = vadd.f32 %v2805_v18, %v2804_v8 }
 0x845   :  { %1252 = vst [vmem:[%s6068_s11] sm:$0xff] %v1222_v40  ;;  %v1225_v16 = vadd.f32 %v2806_v31, %v5287_v37  ;;  %v1281_v40 = vld [vmem:[%s6059_s2 + $0x80] sm:$0xff]  ;;  %v1282_v31 = vld [vmem:[%s6059_s2 + $0x88] sm:$0xff] }
 0x847   :  { %1253 = vst [vmem:[%s6068_s11 + $0x8] sm:$0xff] %v1225_v16  ;;  %v2807_v33 = vpop.f32.mrb[28].mxu1  ;;  %v1265_v16 = vld [vmem:[%s6059_s2] sm:$0xff] }
 0x848   :  { %v2808_v36 = vpop.f32.mrb[29].mxu1 }
 0x849   :  { %v2809_v4 = vadd.f32 %v2808_v36, %v2807_v33  ;;  %v2810_v35 = vpop.f32.mrb[30].mxu1  ;;  %v5322_v33 = vpack.c.bf16 %v1282_v31, %v1281_v40  ;;  %v1266_v36 = vld [vmem:[%s6059_s2 + $0x8] sm:$0xff] }
 0x84a   :  { %v2811_v49 = vpop.f32.mrb[31].mxu1 }
 0x84b   :  { %v1230_v39 = vadd.f32 %v2809_v4, %v5287_v37  ;;  %v2812_v48 = vadd.f32 %v2811_v49, %v2810_v35  ;;  %v1283_v4 = vld [vmem:[%s6059_s2 + $0x90] sm:$0xff]  ;;  %v1284_v35 = vld [vmem:[%s6059_s2 + $0x98] sm:$0xff]  ;;  %v5333_v49 = vpack.c.bf16 %v1266_v36, %v1265_v16  ;;  %3654 = vmatprep.subr.bf16.mxu1 %v5322_v33 }
 0x84c   :  { %v1271_v16 = vld [vmem:[%s6059_s2 + $0x30] sm:$0xff]  ;;  %v1272_v36 = vld [vmem:[%s6059_s2 + $0x38] sm:$0xff] }
 0x84d   :  { %1254 = vst [vmem:[%s6068_s11 + $0x10] sm:$0xff] %v1230_v39  ;;  %v1233_v61 = vadd.f32 %v2812_v48, %v5287_v37  ;;  %6198 = vst [vmem:[#allocation21_spill] sm:$0xff] %v5333_v49  ;;  %v5335_v39 = vpack.c.bf16 %v1284_v35, %v1283_v4  ;;  %v1267_v48 = vld [vmem:[%s6059_s2 + $0x10] sm:$0xff]  ;;  %3656 = vmatpush3.bf16.msra.mxu1 %v5333_v49  ;;  %v1289_v4 = vld [vmem:[%s6059_s2 + $0xc0] sm:$0xff] }
 0x84e   :  { %v1290_v35 = vld [vmem:[%s6059_s2 + $0xc8] sm:$0xff] }
 0x84f   :  { %1255 = vst [vmem:[%s6068_s11 + $0x18] sm:$0xff] %v1233_v61  ;;  %v2813_v58 = vpop.f32.mrb[32].mxu1  ;;  %6199 = vst [vmem:[#allocation22_spill] sm:$0xff] %v5335_v39  ;;  %v1268_v61 = vld [vmem:[%s6059_s2 + $0x18] sm:$0xff]  ;;  %3658 = vmatprep.subr.bf16.mxu1 %v5335_v39 }
 0x850   :  { %v2814_v47 = vpop.f32.mrb[33].mxu1 }
 0x851   :  { %v2815_v52 = vadd.f32 %v2814_v47, %v2813_v58  ;;  %v2816_v63 = vpop.f32.mrb[34].mxu1  ;;  %v1285_v58 = vld [vmem:[%s6059_s2 + $0xa0] sm:$0xff]  ;;  %v1286_v47 = vld [vmem:[%s6059_s2 + $0xa8] sm:$0xff] }
 0x852   :  { %v2817_v13 = vpop.f32.mrb[35].mxu1 }
 0x853   :  { %v1238_v12 = vadd.f32 %v2815_v52, %v5287_v37  ;;  %v2818_v8 = vadd.f32 %v2817_v13, %v2816_v63  ;;  %v5351_v52 = vpack.c.bf16 %v1268_v61, %v1267_v48  ;;  %v5354_v63 = vpack.c.bf16 %v1286_v47, %v1285_v58  ;;  %v1269_v13 = vld [vmem:[%s6059_s2 + $0x20] sm:$0xff]  ;;  %v1274_v47 = vld [vmem:[%s6059_s2 + $0x48] sm:$0xff] }
 0x854   :  { %v5387_v48 = vpack.c.bf16 %v1272_v36, %v1271_v16  ;;  %v5390_v61 = vpack.c.bf16 %v1290_v35, %v1289_v4  ;;  %v1273_v58 = vld [vmem:[%s6059_s2 + $0x40] sm:$0xff]  ;;  %v1275_v16 = vld [vmem:[%s6059_s2 + $0x50] sm:$0xff]  ;;  %v1276_v36 = vld [vmem:[%s6059_s2 + $0x58] sm:$0xff] }
 0x855   :  { %1256 = vst [vmem:[%s6068_s11 + $0x20] sm:$0xff] %v1238_v12  ;;  %v1241_v18 = vadd.f32 %v2818_v8, %v5287_v37  ;;  %6200 = vst [vmem:[#allocation23_spill] sm:$0xff] %v5351_v52  ;;  %v1270_v12 = vld [vmem:[%s6059_s2 + $0x28] sm:$0xff]  ;;  %v1287_v8 = vld [vmem:[%s6059_s2 + $0xb0] sm:$0xff]  ;;  %3660 = vmatpush3.bf16.msra.mxu1 %v5351_v52 }
 0x856   :  { %6201 = vst [vmem:[#allocation24_spill] sm:$0xff] %v5354_v63  ;;  %v5369_v40 = vpack.c.bf16 %v1270_v12, %v1269_v13  ;;  %3662 = vmatprep.subr.bf16.mxu1 %v5354_v63  ;;  %6204 = vst [vmem:[#allocation27_spill] sm:$0xff] %v5387_v48  ;;  %v1291_v13 = vld [vmem:[%s6059_s2 + $0xd0] sm:$0xff]  ;;  %v1292_v12 = vld [vmem:[%s6059_s2 + $0xd8] sm:$0xff] }
 0x857   :  { %1257 = vst [vmem:[%s6068_s11 + $0x28] sm:$0xff] %v1241_v18  ;;  %v1288_v18 = vld [vmem:[%s6059_s2 + $0xb8] sm:$0xff]  ;;  %6205 = vst [vmem:[#allocation28_spill] sm:$0xff] %v5390_v61  ;;  %v1293_v4 = vld [vmem:[%s6059_s2 + $0xe0] sm:$0xff] }
 0x858   :  { %6202 = vst [vmem:[#allocation25_spill] sm:$0xff] %v5369_v40  ;;  %v5372_v31 = vpack.c.bf16 %v1288_v18, %v1287_v8  ;;  %v5405_v8 = vpack.c.bf16 %v1274_v47, %v1273_v58  ;;  %v5408_v18 = vpack.c.bf16 %v1292_v12, %v1291_v13  ;;  %v1294_v35 = vld [vmem:[%s6059_s2 + $0xe8] sm:$0xff]  ;;  %v5423_v58 = vpack.c.bf16 %v1276_v36, %v1275_v16 }
 0x859   :  { %3664 = vmatpush3.bf16.msra.mxu1 %v5369_v40  ;;  %v5426_v47 = vpack.c.bf16 %v1294_v35, %v1293_v4 }
 0x85a   :  { %6203 = vst [vmem:[#allocation26_spill] sm:$0xff] %v5372_v31  ;;  %3666 = vmatprep.subr.bf16.mxu1 %v5372_v31  ;;  %6206 = vst [vmem:[#allocation29_spill] sm:$0xff] %v5405_v8 }
 0x85b   :  { %6207 = vst [vmem:[#allocation30_spill] sm:$0xff] %v5408_v18  ;;  %6208 = vst [vmem:[#allocation31_spill] sm:$0xff] %v5423_v58 }
 0x85c   :  { %6209 = vst [vmem:[#allocation32_spill] sm:$0xff] %v5426_v47 }
 0x85d   :  { %3668 = vmatpush3.bf16.msra.mxu1 %v5387_v48 }
 0x85e   :  { %3670 = vmatprep.subr.bf16.mxu1 %v5390_v61 }
 0x861   :  { %3672 = vmatpush3.bf16.msra.mxu1 %v5405_v8 }
 0x862   :  { %3674 = vmatprep.subr.bf16.mxu1 %v5408_v18 }
 0x865   :  { %3676 = vmatpush3.bf16.msra.mxu1 %v5423_v58 }
 0x866   :  { %3678 = vmatprep.subr.bf16.mxu1 %v5426_v47 }
 0x8e2   :  { %v1099_v13 = vpop.f32.mrb[28].mxu0 }
 0x8e3   :  { %v1100_v12 = vadd.f32 %v1099_v13, %v5262_v0  ;;  %v1101_v61 = vpop.f32.mrb[29].mxu0  ;;  %v1368_v13 = vld [vmem:[%s6062_s4] sm:$0xff] }
 0x8e4   :  { %v1102_v48 = vadd.f32 %v1101_v61, %v5265_v25  ;;  %v1103_v31 = vpop.f32.mrb[30].mxu0  ;;  %v1277_v61 = vld [vmem:[%s6059_s2 + $0x60] sm:$0xff] }
 0x8e5   :  { %v1104_v40 = vadd.f32 %v1103_v31, %v5262_v0  ;;  %v1105_v8 = vpop.f32.mrb[31].mxu0  ;;  %v1120_v36 = vmax.f32 %v1100_v12, 0.0  ;;  %v1278_v0 = vld [vmem:[%s6059_s2 + $0x68] sm:$0xff] }
 0x8e6   :  { %v1106_v16 = vadd.f32 %v1105_v8, %v5265_v25  ;;  %v1121_v4 = vmax.f32 %v1102_v48, 0.0  ;;  %v5441_v31 = vpack.c.bf16 %v1278_v0, %v1277_v61  ;;  %v1295_v25 = vld [vmem:[%s6059_s2 + $0xf0] sm:$0xff]  ;;  %v1280_v48 = vld [vmem:[%s6059_s2 + $0x78] sm:$0xff]  ;;  %v1372_v0 = vld [vmem:[%s6062_s4 + $0x20] sm:$0xff] }
 0x8e7   :  { %v1122_v18 = vmax.f32 %v1104_v40, 0.0  ;;  %v1279_v40 = vld [vmem:[%s6059_s2 + $0x70] sm:$0xff] }
 0x8e8   :  { %v1123_v35 = vmax.f32 %v1106_v16, 0.0  ;;  %6210 = vst [vmem:[#allocation33_spill] sm:$0xff] %v5441_v31  ;;  %3680 = vmatpush3.bf16.msra.mxu1 %v5441_v31  ;;  %v5458_v8 = vpack.c.bf16 %v1280_v48, %v1279_v40  ;;  %v1370_v16 = vld [vmem:[%s6062_s4 + $0x10] sm:$0xff]  ;;  %v1379_v40 = vld [vmem:[%s6062_s4 + $0x58] sm:$0xff] }
 0x8e9   :  { %v1130_v63 = vpack.c.bf16 %v1122_v18, %v1120_v36  ;;  %v1369_v18 = vld [vmem:[%s6062_s4 + $0x8] sm:$0xff] }
 0x8ea   :  { %v1131_v58 = vpack.c.bf16 %v1123_v35, %v1121_v4  ;;  %6212 = vst [vmem:[#allocation35_spill] sm:$0xff] %v5458_v8  ;;  %v1373_v36 = vld [vmem:[%s6062_s4 + $0x28] sm:$0xff]  ;;  %v1375_v4 = vld [vmem:[%s6062_s4 + $0x38] sm:$0xff]  ;;  %v5482_v35 = vpack.c.bf16 %v1370_v16, %v1368_v13  ;;  %v1378_v13 = vld [vmem:[%s6062_s4 + $0x50] sm:$0xff] }
 0x8eb   :  { %v5484_v61 = vpack.c.bf16 %v1375_v4, %v1373_v36  ;;  %v1381_v16 = vld [vmem:[%s6062_s4 + $0x68] sm:$0xff]  ;;  %v1383_v36 = vld [vmem:[%s6062_s4 + $0x78] sm:$0xff] }
 0x8ec   :  { %1243 = vmatprep.mubr.bf16.mxu1 %v1131_v58  ;;  %v1371_v58 = vld [vmem:[%s6062_s4 + $0x18] sm:$0xff] }
 0x8ed   :  { %1244 = vmatmul.mubr.bf16.gmra.mrb[36].mxu1 %v1130_v63  ;;  %v5471_v12 = vpack.c.bf16 %v1371_v58, %v1369_v18  ;;  %6213 = vst [vmem:[#allocation36_spill] sm:$0xff] %v5484_v61  ;;  %v1376_v58 = vld [vmem:[%s6062_s4 + $0x40] sm:$0xff] }
 0x8ee   :  { %1361 = vmatprep.mubr.f32.mxu1 %v5254_v57  ;;  %v1296_v57 = vld [vmem:[%s6059_s2 + $0xf8] sm:$0xff]  ;;  %v5518_v4 = vpack.c.bf16 %v1378_v13, %v1376_v58 }
 0x8ef   :  { %v5450_v63 = vpack.c.bf16 %v1296_v57, %v1295_v25  ;;  %v1374_v25 = vld [vmem:[%s6062_s4 + $0x30] sm:$0xff]  ;;  %v1377_v57 = vld [vmem:[%s6062_s4 + $0x48] sm:$0xff]  ;;  %3686 = vmatprep.subr.bf16.mxu0 %v5471_v12 }
 0x8f0   :  { %3688 = vmatpush1.bf16.msra.mxu0 %v5482_v35  ;;  %v5500_v48 = vpack.c.bf16 %v1374_v25, %v1372_v0  ;;  %v5503_v18 = vpack.c.bf16 %v1379_v40, %v1377_v57  ;;  %6216 = vst [vmem:[#allocation39_spill] sm:$0xff] %v5518_v4  ;;  %v5521_v0 = vpack.c.bf16 %v1383_v36, %v1381_v16  ;;  %v1380_v25 = vld [vmem:[%s6062_s4 + $0x60] sm:$0xff]  ;;  %v1382_v57 = vld [vmem:[%s6062_s4 + $0x70] sm:$0xff] }
 0x8f1   :  { %6211 = vst [vmem:[#allocation34_spill] sm:$0xff] %v5450_v63  ;;  %3682 = vmatprep.subr.bf16.mxu1 %v5450_v63  ;;  %3690 = vmatprep.subr.bf16.mxu0 %v5484_v61  ;;  %v5530_v40 = vpack.c.bf16 %v1382_v57, %v1380_v25  ;;  %v1385_v25 = vld [vmem:[%s6062_s4 + $0x88] sm:$0xff]  ;;  %v1387_v57 = vld [vmem:[%s6062_s4 + $0x98] sm:$0xff] }
 0x8f2   :  { %3684 = vmatpush3.bf16.msra.mxu1 %v5458_v8  ;;  %6214 = vst [vmem:[#allocation37_spill] sm:$0xff] %v5500_v48  ;;  %6215 = vst [vmem:[#allocation38_spill] sm:$0xff] %v5503_v18 }
 0x8f3   :  { %6217 = vst [vmem:[#allocation40_spill] sm:$0xff] %v5521_v0  ;;  %6218 = vst [vmem:[#allocation41_spill] sm:$0xff] %v5530_v40 }
 0x8f4   :  { %3692 = vmatpush1.bf16.msra.mxu0 %v5500_v48 }
 0x8f5   :  { %3694 = vmatprep.subr.bf16.mxu0 %v5503_v18 }
 0x8f8   :  { %3696 = vmatpush1.bf16.msra.mxu0 %v5518_v4 }
 0x8f9   :  { %3698 = vmatprep.subr.bf16.mxu0 %v5521_v0 }
 0x8fc   :  { %3700 = vmatpush1.bf16.msra.mxu0 %v5530_v40 }
 0x9c0   :  { %v2819_v58 = vpop.f32.mrb[36].mxu1 }
 0x9c1   :  { %v2820_v13 = vpop.f32.mrb[37].mxu1 }
 0x9c2   :  { %v2821_v16 = vadd.f32 %v2820_v13, %v2819_v58  ;;  %v2822_v36 = vpop.f32.mrb[38].mxu1  ;;  %v1391_v13 = vld [vmem:[%s6062_s4 + $0xb8] sm:$0xff] }
 0x9c3   :  { %v2823_v8 = vpop.f32.mrb[39].mxu1 }
 0x9c4   :  { %v1246_v63 = vadd.f32 %v2821_v16, %v5287_v37  ;;  %v2824_v31 = vadd.f32 %v2823_v8, %v2822_v36  ;;  %v5548_v8 = vpack.c.bf16 %v1387_v57, %v1385_v25  ;;  %v1388_v36 = vld [vmem:[%s6062_s4 + $0xa0] sm:$0xff]  ;;  %v1390_v25 = vld [vmem:[%s6062_s4 + $0xb0] sm:$0xff] }
 0x9c5   :  { %v5574_v57 = vpack.c.bf16 %v1390_v25, %v1388_v36  ;;  %v1394_v36 = vld [vmem:[%s6062_s4 + $0xd0] sm:$0xff]  ;;  %v1397_v25 = vld [vmem:[%s6062_s4 + $0xe8] sm:$0xff] }
 0x9c6   :  { %1258 = vst [vmem:[%s6068_s11 + $0x30] sm:$0xff] %v1246_v63  ;;  %v1249_v47 = vadd.f32 %v2824_v31, %v5287_v37  ;;  %6219 = vst [vmem:[#allocation42_spill] sm:$0xff] %v5548_v8  ;;  %v1384_v63 = vld [vmem:[%s6062_s4 + $0x80] sm:$0xff]  ;;  %v1386_v31 = vld [vmem:[%s6062_s4 + $0x90] sm:$0xff]  ;;  %3702 = vmatprep.subr.bf16.mxu0 %v5548_v8 }
 0x9c7   :  { %v5556_v58 = vpack.c.bf16 %v1386_v31, %v1384_v63  ;;  %6222 = vst [vmem:[#allocation45_spill] sm:$0xff] %v5574_v57  ;;  %v1393_v63 = vld [vmem:[%s6062_s4 + $0xc8] sm:$0xff]  ;;  %v1395_v31 = vld [vmem:[%s6062_s4 + $0xd8] sm:$0xff] }
 0x9c8   :  { %1259 = vst [vmem:[%s6068_s11 + $0x38] sm:$0xff] %v1249_v47  ;;  %1362 = vmatmul.mubr.f32.vlgmr.msra.gmra.mrb[40].mxu1 %v1249_v47  ;;  %v1389_v47 = vld [vmem:[%s6062_s4 + $0xa8] sm:$0xff]  ;;  %v1399_v37 = vld [vmem:[%s6062_s4 + $0xf8] sm:$0xff] }
 0x9c9   :  { %6220 = vst [vmem:[#allocation43_spill] sm:$0xff] %v5556_v58  ;;  %3704 = vmatpush1.bf16.msra.mxu0 %v5556_v58  ;;  %v5566_v16 = vpack.c.bf16 %v1391_v13, %v1389_v47  ;;  %v1392_v47 = vld [vmem:[%s6062_s4 + $0xc0] sm:$0xff]  ;;  %v5587_v13 = vpack.c.bf16 %v1395_v31, %v1393_v63  ;;  %v5600_v39 = vpack.c.bf16 %v1399_v37, %v1397_v25  ;;  %v1398_v31 = vld [vmem:[%s6062_s4 + $0xf0] sm:$0xff]  ;;  %v1486_v37 = vld [vmem:[%s6063_s6 + $0x8] sm:$0xff] }
 0x9ca   :  { %v5598_v52 = vpack.c.bf16 %v1394_v36, %v1392_v47  ;;  %v1396_v63 = vld [vmem:[%s6062_s4 + $0xe0] sm:$0xff]  ;;  %v1488_v47 = vld [vmem:[%s6063_s6 + $0x18] sm:$0xff] }
 0x9cb   :  { %6221 = vst [vmem:[#allocation44_spill] sm:$0xff] %v5566_v16  ;;  %3706 = vmatprep.subr.bf16.mxu0 %v5566_v16  ;;  %6223 = vst [vmem:[#allocation46_spill] sm:$0xff] %v5587_v13  ;;  %v5610_v49 = vpack.c.bf16 %v1398_v31, %v1396_v63  ;;  %v1485_v36 = vld [vmem:[%s6063_s6] sm:$0xff]  ;;  %v5624_v25 = vpack.c.bf16 %v1488_v47, %v1486_v37  ;;  %v1487_v63 = vld [vmem:[%s6063_s6 + $0x10] sm:$0xff] }
 0x9cc   :  { %6224 = vst [vmem:[#allocation47_spill] sm:$0xff] %v5598_v52  ;;  %6225 = vst [vmem:[#allocation48_spill] sm:$0xff] %v5600_v39  ;;  %v1490_v31 = vld [vmem:[%s6063_s6 + $0x28] sm:$0xff]  ;;  %v1489_v37 = vld [vmem:[%s6063_s6 + $0x20] sm:$0xff] }
 0x9cd   :  { %3708 = vmatpush1.bf16.msra.mxu0 %v5574_v57  ;;  %6226 = vst [vmem:[#allocation49_spill] sm:$0xff] %v5610_v49  ;;  %6227 = vst [vmem:[#allocation50_spill] sm:$0xff] %v5624_v25  ;;  %v1491_v47 = vld [vmem:[%s6063_s6 + $0x30] sm:$0xff]  ;;  %3718 = vmatprep.subr.bf16.mxu1 %v5624_v25 }
 0x9ce   :  { %3710 = vmatprep.subr.bf16.mxu0 %v5587_v13  ;;  %v1495_v25 = vld [vmem:[%s6063_s6 + $0x50] sm:$0xff]  ;;  %v1498_v13 = vld [vmem:[%s6063_s6 + $0x68] sm:$0xff] }
 0x9d1   :  { %3712 = vmatpush1.bf16.msra.mxu0 %v5598_v52  ;;  %v1494_v52 = vld [vmem:[%s6063_s6 + $0x48] sm:$0xff] }
 0x9d2   :  { %3714 = vmatprep.subr.bf16.mxu0 %v5600_v39 }
 0x9d5   :  { %3716 = vmatpush1.bf16.msra.mxu0 %v5610_v49  ;;  %v5635_v49 = vpack.c.bf16 %v1487_v63, %v1485_v36  ;;  %v1496_v36 = vld [vmem:[%s6063_s6 + $0x58] sm:$0xff] }
 0x9d6   :  { %3782 = vmatprep.subr.bf16.mxu0 %v5117_v32  ;;  %v1492_v32 = vld [vmem:[%s6063_s6 + $0x38] sm:$0xff]  ;;  %v5656_v63 = vpack.c.bf16 %v1496_v36, %v1494_v52  ;;  %v1497_v36 = vld [vmem:[%s6063_s6 + $0x60] sm:$0xff] }
 0x9d7   :  { %6228 = vst [vmem:[#allocation51_spill] sm:$0xff] %v5635_v49  ;;  %v5637_v39 = vpack.c.bf16 %v1492_v32, %v1490_v31  ;;  %3720 = vmatpush1.bf16.msra.mxu1 %v5635_v49  ;;  %v5653_v32 = vpack.c.bf16 %v1491_v47, %v1489_v37  ;;  %v1493_v31 = vld [vmem:[%s6063_s6 + $0x40] sm:$0xff]  ;;  %v1500_v37 = vld [vmem:[%s6063_s6 + $0x78] sm:$0xff]  ;;  %v1502_v49 = vld [vmem:[%s6063_s6 + $0x88] sm:$0xff] }
 0x9d8   :  { %6231 = vst [vmem:[#allocation54_spill] sm:$0xff] %v5656_v63  ;;  %v5671_v52 = vpack.c.bf16 %v1495_v25, %v1493_v31  ;;  %v5674_v47 = vpack.c.bf16 %v1500_v37, %v1498_v13  ;;  %v1504_v25 = vld [vmem:[%s6063_s6 + $0x98] sm:$0xff]  ;;  %v1501_v37 = vld [vmem:[%s6063_s6 + $0x80] sm:$0xff] }
 0x9d9   :  { %6229 = vst [vmem:[#allocation52_spill] sm:$0xff] %v5637_v39  ;;  %6230 = vst [vmem:[#allocation53_spill] sm:$0xff] %v5653_v32  ;;  %3722 = vmatprep.subr.bf16.mxu1 %v5637_v39  ;;  %v1499_v39 = vld [vmem:[%s6063_s6 + $0x70] sm:$0xff]  ;;  %v5692_v31 = vpack.c.bf16 %v1504_v25, %v1502_v49 }
 0x9da   :  { %v5689_v13 = vpack.c.bf16 %v1499_v39, %v1497_v36  ;;  %v5731_v36 = vld [vmem:[%s6061_s3] ss:$0 sm:$0xff] }
 0x9db   :  { %3724 = vmatpush1.bf16.msra.mxu1 %v5653_v32 }
 0x9dc   :  { %3726 = vmatprep.subr.bf16.mxu1 %v5656_v63  ;;  %v1503_v63 = vld [vmem:[%s6063_s6 + $0x90] sm:$0xff] }
 0x9dd   :  { %v5701_v32 = vpack.c.bf16 %v1503_v63, %v1501_v37 }
 0x9df   :  { %3728 = vmatpush1.bf16.msra.mxu1 %v5671_v52 }
 0x9e0   :  { %3730 = vmatprep.subr.bf16.mxu1 %v5674_v47 }
 0x9e3   :  { %3732 = vmatpush1.bf16.msra.mxu1 %v5689_v13 }
 0x9e4   :  { %3734 = vmatprep.subr.bf16.mxu1 %v5692_v31 }
 0x9e7   :  { %3736 = vmatpush1.bf16.msra.mxu1 %v5701_v32 }
 0x9e8   :  { %3738 = vmatprep.subr.bf16.mxu1 %v4889_v7 }
 0x9eb   :  { %3740 = vmatpush1.bf16.msra.mxu1 %v4909_v19 }
 0x9ec   :  { %3742 = vmatprep.subr.bf16.mxu1 %v4912_v23 }
 0x9ef   :  { %3744 = vmatpush1.bf16.msra.mxu1 %v4930_v1 }
 0x9f0   :  { %3746 = vmatprep.subr.bf16.mxu1 %v4934_v22 }
 0x9f3   :  { %3748 = vmatpush1.bf16.msra.mxu1 %v4951_v38 }
 0x9f4   :  { %3750 = vmatprep.subr.bf16.mxu1 %v4954_v42 }
 0x9f7   :  { %3752 = vmatpush1.bf16.msra.mxu1 %v4972_v53 }
 0x9f8   :  { %3754 = vmatprep.subr.bf16.mxu1 %v4976_v55 }
 0x9fb   :  { %3756 = vmatpush1.bf16.msra.mxu1 %v4993_v11 }
 0x9fc   :  { %3758 = vmatprep.subr.bf16.mxu1 %v4998_v17 }
 0x9ff   :  { %3760 = vmatpush1.bf16.msra.mxu1 %v5016_v21 }
 0xa00   :  { %3762 = vmatprep.subr.bf16.mxu1 %v5020_v27 }
 0xa03   :  { %3764 = vmatpush1.bf16.msra.mxu1 %v5035_v43 }
 0xa04   :  { %3766 = vmatprep.subr.bf16.mxu1 %v5038_v45 }
 0xa07   :  { %3768 = vmatpush1.bf16.msra.mxu1 %v5053_v50 }
 0xa08   :  { %3770 = vmatprep.subr.bf16.mxu1 %v5056_v51 }
 0xa0b   :  { %3772 = vmatpush1.bf16.msra.mxu1 %v5071_v59 }
 0xa0c   :  { %3774 = vmatprep.subr.bf16.mxu1 %v5074_v60 }
 0xa0f   :  { %3776 = vmatpush1.bf16.msra.mxu1 %v5089_v14 }
 0xa10   :  { %3778 = vmatprep.subr.bf16.mxu1 %v5092_v20 }
 0xa13   :  { %3780 = vmatpush1.bf16.msra.mxu1 %v5101_v26 }
 0xa14   :  { %3846 = vmatprep.subr.bf16.mxu1 %v5471_v12 }
 0xa9b   :  { %v2857_v49 = vpop.f32.mrb[40].mxu1 }
 0xa9c   :  { %v2858_v39 = vpop.f32.mrb[41].mxu1 }
 0xa9d   :  { %v2859_v63 = vadd.f32 %v2858_v39, %v2857_v49  ;;  %v1400_v49 = vld [vmem:[%s6064_s5] sm:$0x3] }
 0xa9e   :  { %v5754_v39 = vrot.slane %v1400_v49, %v4876_v62 }
 0xa9f   :  { %v1364_v25 = vadd.f32 %v5731_v36, %v2859_v63  ;;  %v5757_v63 = vrot.slane %v1400_v49, %v4887_v5  ;;  %v1260_v49 = vld [vmem:[%s6069_s0] sm:$0xff] }
 0xaa0   :  { %6232 = vst [vmem:[#allocation55_spill] sm:$0xff] %v5754_v39 }
 0xaa1   :  { %4314 = vtanh.f32 %v1364_v25 }
 0xaab   :  { %v4315_v37 = vpop.eup %4314 }
 0xaac   :  { %1477 = vmatmul.mubr.f32.vlgmr.msra.gmra.mrb[32].mxu0 %v4315_v37 }
 0xaad   :  { %3784 = vmatpush3.bf16.msra.mxu0 %v5128_v9 }
 0xaae   :  { %3786 = vmatprep.subr.bf16.mxu0 %v5130_v15 }
 0xab1   :  { %3788 = vmatpush3.bf16.msra.mxu0 %v5146_v28 }
 0xab2   :  { %3790 = vmatprep.subr.bf16.mxu0 %v5149_v2 }
 0xab5   :  { %3792 = vmatpush3.bf16.msra.mxu0 %v5164_v44 }
 0xab6   :  { %3794 = vmatprep.subr.bf16.mxu0 %v5167_v46 }
 0xab9   :  { %3796 = vmatpush3.bf16.msra.mxu0 %v5182_v54 }
 0xaba   :  { %3798 = vmatprep.subr.bf16.mxu0 %v5185_v56 }
 0xabd   :  { %3800 = vmatpush3.bf16.msra.mxu0 %v5200_v3 }
 0xabe   :  { %3802 = vmatprep.subr.bf16.mxu0 %v5203_v24 }
 0xac1   :  { %3804 = vmatpush3.bf16.msra.mxu0 %v5213_v30 }
 0xac2   :  { %3806 = vmatprep.subr.bf16.mxu0 %v5222_v6 }
 0xac5   :  { %3808 = vmatpush3.bf16.msra.mxu0 %v5230_v34 }
 0xac6   :  { %3810 = vmatprep.subr.bf16.mxu0 %v5240_v10 }
 0xac9   :  { %3812 = vmatpush3.bf16.msra.mxu0 %v5248_v41 }
 0xaca   :  { %3814 = vmatprep.subr.bf16.mxu0 %v5322_v33 }
 0xb7f   :  { %v1478_v25 = vpop.f32.mrb[32].mxu0 }
 0xb80   :  { %v1479_v6 = vadd.f32 %v1478_v25, %v5754_v39  ;;  %v1480_v34 = vpop.f32.mrb[33].mxu0  ;;  %v2623_v25 = vadd.s32 4294967295, %v1260_v49  ;;  %v6238_v49 = vld [vmem:[#allocation21_spill] sm:$0xff] }
 0xb81   :  { %v1481_v10 = vadd.f32 %v1480_v34, %v5757_v63  ;;  %v6235_v34 = vld [vmem:[#allocation48_spill] sm:$0xff] }
 0xb82   :  { %v1483_v41 = vmax.f32 %v1479_v6, 0.0  ;;  %v6234_v6 = vld [vmem:[#allocation47_spill] sm:$0xff]  ;;  %1263 = vperm.xlu0 %4297, %v2623_v25   ;;  %v6239_v25 = vld [vmem:[#allocation22_spill] sm:$0xff] }
 0xb83   :  { %v1484_v30 = vmax.f32 %v1481_v10, 0.0  ;;  %v6236_v10 = vld [vmem:[#allocation49_spill] sm:$0xff] }
 0xb85   :  { %1625 = vmatprep.mubr.f32.mxu1 %v1484_v30  ;;  %v6233_v30 = vld [vmem:[#allocation46_spill] sm:$0xff] }
 0xb86   :  { %1626 = vmatmul.mubr.f32.vlgmr.msra.gmra.mrb[42].mxu1 %v1483_v41  ;;  %v6237_v41 = vld [vmem:[#allocation7_spill] sm:$0xff] }
 0xb87   :  { %3848 = vmatpush1.bf16.msra.mxu1 %v5482_v35  ;;  %1880 = vmatprep.mubr.f32.mxu1 %v6196_v29 }
 0xb88   :  { %3850 = vmatprep.subr.bf16.mxu1 %v5484_v61 }
 0xb8b   :  { %3852 = vmatpush1.bf16.msra.mxu1 %v5500_v48 }
 0xb8c   :  { %3854 = vmatprep.subr.bf16.mxu1 %v5503_v18 }
 0xb8f   :  { %3856 = vmatpush1.bf16.msra.mxu1 %v5518_v4 }
 0xb90   :  { %3858 = vmatprep.subr.bf16.mxu1 %v5521_v0 }
 0xb93   :  { %3860 = vmatpush1.bf16.msra.mxu1 %v5530_v40  ;;  %v6241_v40 = vld [vmem:[#allocation24_spill] sm:$0xff] }
 0xb94   :  { %3862 = vmatprep.subr.bf16.mxu1 %v5548_v8 }
 0xb97   :  { %3864 = vmatpush1.bf16.msra.mxu1 %v5556_v58 }
 0xb98   :  { %3866 = vmatprep.subr.bf16.mxu1 %v5566_v16 }
 0xb9b   :  { %3868 = vmatpush1.bf16.msra.mxu1 %v5574_v57  ;;  %v1549_v57 = vld [vmem:[%s6066_s7] sm:$0x3] }
 0xb9c   :  { %3870 = vmatprep.subr.bf16.mxu1 %v6233_v30  ;;  %v5785_v30 = vrot.slane %v1549_v57, %v4876_v62  ;;  %v6240_v62 = vld [vmem:[#allocation23_spill] sm:$0xff] }
 0xb9f   :  { %3872 = vmatpush1.bf16.msra.mxu1 %v6234_v6  ;;  %v5788_v6 = vrot.slane %v1549_v57, %v4887_v5  ;;  %v6242_v5 = vld [vmem:[#allocation25_spill] sm:$0xff]  ;;  %v6243_v57 = vld [vmem:[#allocation26_spill] sm:$0xff] }
 0xba0   :  { %3874 = vmatprep.subr.bf16.mxu1 %v6235_v34 }
 0xba3   :  { %3876 = vmatpush1.bf16.msra.mxu1 %v6236_v10 }
 0xba4   :  { %3942 = vmatprep.subr.bf16.mxu1 %v6237_v41 }
 0xc59   :  { %v1627_v34 = vpop.f32.mrb[42].mxu1 }
 0xc5a   :  { %v1628_v10 = vadd.f32 %v1627_v34, %v5785_v30  ;;  %v1629_v41 = vpop.f32.mrb[43].mxu1  ;;  %v6244_v34 = vld [vmem:[#allocation27_spill] sm:$0xff] }
 0xc5b   :  { %v1630_v16 = vadd.f32 %v1629_v41, %v5788_v6  ;;  %v6245_v41 = vld [vmem:[#allocation28_spill] sm:$0xff] }
 0xc5c   :  { %v1632_v8 = vmax.f32 %v1628_v10, 0.0  ;;  %v6250_v10 = vld [vmem:[#allocation33_spill] sm:$0xff] }
 0xc5d   :  { %v1633_v58 = vmax.f32 %v1630_v16, 0.0  ;;  %v6246_v16 = vld [vmem:[#allocation29_spill] sm:$0xff] }
 0xc5f   :  { %1737 = vmatprep.mubr.f32.mxu0 %v1633_v58  ;;  %v6248_v58 = vld [vmem:[#allocation31_spill] sm:$0xff] }
 0xc60   :  { %1738 = vmatmul.mubr.f32.vlgmr.msra.gmra.mrb[34].mxu0 %v1632_v8  ;;  %v6247_v8 = vld [vmem:[#allocation30_spill] sm:$0xff] }
 0xc61   :  { %1809 = vmatprep.mubr.f32.mxu0 %v4315_v37  ;;  %3816 = vmatpush3.bf16.msra.mxu0 %v6238_v49  ;;  %v6249_v37 = vld [vmem:[#allocation32_spill] sm:$0xff] }
 0xc62   :  { %3818 = vmatprep.subr.bf16.mxu0 %v6239_v25 }
 0xc65   :  { %3820 = vmatpush3.bf16.msra.mxu0 %v6240_v62  ;;  %v6251_v62 = vld [vmem:[#allocation34_spill] sm:$0xff] }
 0xc66   :  { %3822 = vmatprep.subr.bf16.mxu0 %v6241_v40  ;;  %v6252_v40 = vld [vmem:[#allocation35_spill] sm:$0xff] }
 0xc69   :  { %3824 = vmatpush3.bf16.msra.mxu0 %v6242_v5  ;;  %v6253_v5 = vld [vmem:[#allocation50_spill] sm:$0xff] }
 0xc6a   :  { %3826 = vmatprep.subr.bf16.mxu0 %v6243_v57 }
 0xc6d   :  { %3828 = vmatpush3.bf16.msra.mxu0 %v6244_v34 }
 0xc6e   :  { %3830 = vmatprep.subr.bf16.mxu0 %v6245_v41  ;;  %v6254_v41 = vld [vmem:[#allocation20_spill] sm:$0xff] }
 0xc71   :  { %3832 = vmatpush3.bf16.msra.mxu0 %v6246_v16 }
 0xc72   :  { %3834 = vmatprep.subr.bf16.mxu0 %v6247_v8  ;;  %v6255_v8 = vld [vmem:[#allocation51_spill] sm:$0xff] }
 0xc75   :  { %3836 = vmatpush3.bf16.msra.mxu0 %v6248_v58  ;;  %v6256_v58 = vld [vmem:[#allocation52_spill] sm:$0xff] }
 0xc76   :  { %3838 = vmatprep.subr.bf16.mxu0 %v6249_v37  ;;  %v6257_v37 = vld [vmem:[#allocation53_spill] sm:$0xff] }
 0xc79   :  { %3840 = vmatpush3.bf16.msra.mxu0 %v6250_v10  ;;  %v6258_v10 = vld [vmem:[#allocation54_spill] sm:$0xff] }
 0xc7a   :  { %3842 = vmatprep.subr.bf16.mxu0 %v6251_v62 }
 0xc7d   :  { %3844 = vmatpush3.bf16.msra.mxu0 %v6252_v40 }
 0xc7e   :  { %3878 = vmatprep.subr.bf16.mxu0 %v6253_v5 }
 0xd33   :  { %v2892_v57 = vpop.f32.mrb[34].mxu0 }
 0xd34   :  { %v2893_v34 = vpop.f32.mrb[35].mxu0 }
 0xd35   :  { %v2894_v25 = vadd.f32 %v2893_v34, %v2892_v57 }
 0xd37   :  { %v5809_v49 = vadd.f32 %v2894_v25, %v6254_v41 }
 0xd39   :  { %1810 = vmatmul.mubr.f32.vlgmr.msra.gmra.mrb[36].mxu0 %v5809_v49 }
 0xd3a   :  { %3880 = vmatpush1.bf16.msra.mxu0 %v6255_v8 }
 0xd3b   :  { %3882 = vmatprep.subr.bf16.mxu0 %v6256_v58 }
 0xd3e   :  { %3884 = vmatpush1.bf16.msra.mxu0 %v6257_v37 }
 0xd3f   :  { %3886 = vmatprep.subr.bf16.mxu0 %v6258_v10 }
 0xd42   :  { %3888 = vmatpush1.bf16.msra.mxu0 %v5671_v52 }
 0xd43   :  { %3890 = vmatprep.subr.bf16.mxu0 %v5674_v47 }
 0xd46   :  { %3892 = vmatpush1.bf16.msra.mxu0 %v5689_v13 }
 0xd47   :  { %3894 = vmatprep.subr.bf16.mxu0 %v5692_v31 }
 0xd4a   :  { %3896 = vmatpush1.bf16.msra.mxu0 %v5701_v32 }
 0xd4b   :  { %3898 = vmatprep.subr.bf16.mxu0 %v4889_v7 }
 0xd4e   :  { %3900 = vmatpush1.bf16.msra.mxu0 %v4909_v19 }
 0xd4f   :  { %3902 = vmatprep.subr.bf16.mxu0 %v4912_v23 }
 0xd52   :  { %3904 = vmatpush1.bf16.msra.mxu0 %v4930_v1 }
 0xd53   :  { %3906 = vmatprep.subr.bf16.mxu0 %v4934_v22 }
 0xd56   :  { %3908 = vmatpush1.bf16.msra.mxu0 %v4951_v38 }
 0xd57   :  { %3910 = vmatprep.subr.bf16.mxu0 %v4954_v42 }
 0xd5a   :  { %3912 = vmatpush1.bf16.msra.mxu0 %v4972_v53 }
 0xd5b   :  { %3914 = vmatprep.subr.bf16.mxu0 %v4976_v55 }
 0xd5e   :  { %3916 = vmatpush1.bf16.msra.mxu0 %v4993_v11 }
 0xd5f   :  { %3918 = vmatprep.subr.bf16.mxu0 %v4998_v17 }
 0xd62   :  { %3920 = vmatpush1.bf16.msra.mxu0 %v5016_v21 }
 0xd63   :  { %3922 = vmatprep.subr.bf16.mxu0 %v5020_v27 }
 0xd66   :  { %3924 = vmatpush1.bf16.msra.mxu0 %v5035_v43 }
 0xd67   :  { %3926 = vmatprep.subr.bf16.mxu0 %v5038_v45 }
 0xd6a   :  { %3928 = vmatpush1.bf16.msra.mxu0 %v5053_v50 }
 0xd6b   :  { %3930 = vmatprep.subr.bf16.mxu0 %v5056_v51 }
 0xd6e   :  { %3932 = vmatpush1.bf16.msra.mxu0 %v5071_v59 }
 0xd6f   :  { %3934 = vmatprep.subr.bf16.mxu0 %v5074_v60 }
 0xd72   :  { %3936 = vmatpush1.bf16.msra.mxu0 %v5089_v14 }
 0xd73   :  { %3938 = vmatprep.subr.bf16.mxu0 %v5092_v20 }
 0xd76   :  { %3940 = vmatpush1.bf16.msra.mxu0 %v5101_v26 }
 0xd77   :  { %4006 = vmatprep.subr.bf16.mxu0 %v5471_v12 }
 0xe0c   :  { %v2927_v25 = vpop.f32.mrb[36].mxu0 }
 0xe0d   :  { %v2928_v57 = vpop.f32.mrb[37].mxu0 }
 0xe0e   :  { %v2929_v34 = vadd.f32 %v2928_v57, %v2927_v25  ;;  %v6260_v25 = vld [vmem:[#allocation16_spill] sm:$0xff]  ;;  %v6261_v57 = vld [vmem:[#allocation17_spill] sm:$0xff] }
 0xe10   :  { %v1812_v45 = vadd.f32 %v5731_v36, %v2929_v34  ;;  %v6262_v34 = vld [vmem:[#allocation18_spill] sm:$0xff] }
 0xe12   :  { %4316 = vtanh.f32 %v1812_v45  ;;  %v6259_v45 = vld [vmem:[#allocation15_spill] sm:$0xff] }
 0xe1c   :  { %v4317_v50 = vpop.eup %4316 }
 0xe1d   :  { %1881 = vmatmul.mubr.f32.vlgmr.msra.gmra.mrb[44].mxu1 %v4317_v50 }
 0xe1e   :  { %3944 = vmatpush3.bf16.msra.mxu1 %v5128_v9 }
 0xe1f   :  { %3946 = vmatprep.subr.bf16.mxu1 %v5130_v15 }
 0xe22   :  { %3948 = vmatpush3.bf16.msra.mxu1 %v5146_v28 }
 0xe23   :  { %3950 = vmatprep.subr.bf16.mxu1 %v5149_v2  ;;  %v6263_v2 = vld [vmem:[#allocation19_spill] sm:$0xff] }
 0xe26   :  { %3952 = vmatpush3.bf16.msra.mxu1 %v5164_v44 }
 0xe27   :  { %3954 = vmatprep.subr.bf16.mxu1 %v5167_v46 }
 0xe2a   :  { %3956 = vmatpush3.bf16.msra.mxu1 %v5182_v54 }
 0xe2b   :  { %3958 = vmatprep.subr.bf16.mxu1 %v5185_v56 }
 0xe2e   :  { %3960 = vmatpush3.bf16.msra.mxu1 %v5200_v3 }
 0xe2f   :  { %3962 = vmatprep.subr.bf16.mxu1 %v5203_v24 }
 0xe32   :  { %3964 = vmatpush3.bf16.msra.mxu1 %v6259_v45 }
 0xe33   :  { %3966 = vmatprep.subr.bf16.mxu1 %v6260_v25 }
 0xe36   :  { %3968 = vmatpush3.bf16.msra.mxu1 %v6261_v57 }
 0xe37   :  { %3970 = vmatprep.subr.bf16.mxu1 %v6262_v34 }
 0xe3a   :  { %3972 = vmatpush3.bf16.msra.mxu1 %v6263_v2 }
 0xe3b   :  { %3974 = vmatprep.subr.bf16.mxu1 %v5322_v33 }
 0xef0   :  { %v1882_v46 = vpop.f32.mrb[44].mxu1 }
 0xef1   :  { %v1883_v54 = vadd.f32 %v1882_v46, %v5754_v39  ;;  %v1884_v56 = vpop.f32.mrb[45].mxu1  ;;  %v6264_v46 = vld [vmem:[#allocation41_spill] sm:$0xff] }
 0xef2   :  { %v1885_v3 = vadd.f32 %v1884_v56, %v5757_v63  ;;  %v6265_v56 = vld [vmem:[#allocation42_spill] sm:$0xff] }
 0xef3   :  { %v1887_v24 = vmax.f32 %v1883_v54, 0.0  ;;  %v6267_v54 = vld [vmem:[#allocation44_spill] sm:$0xff] }
 0xef4   :  { %v1888_v44 = vmax.f32 %v1885_v3, 0.0  ;;  %v6268_v3 = vld [vmem:[#allocation45_spill] sm:$0xff] }
 0xef6   :  { %1953 = vmatprep.mubr.f32.mxu0 %v1888_v44  ;;  %v6266_v44 = vld [vmem:[#allocation43_spill] sm:$0xff] }
 0xef7   :  { %1954 = vmatmul.mubr.f32.vlgmr.msra.gmra.mrb[38].mxu0 %v1887_v24  ;;  %v6269_v24 = vld [vmem:[#allocation46_spill] sm:$0xff] }
 0xef8   :  { %4008 = vmatpush1.bf16.msra.mxu0 %v5482_v35  ;;  %2169 = vmatprep.mubr.f32.mxu0 %v6196_v29 }
 0xef9   :  { %4010 = vmatprep.subr.bf16.mxu0 %v5484_v61  ;;  %v6270_v61 = vld [vmem:[#allocation47_spill] sm:$0xff] }
 0xefc   :  { %4012 = vmatpush1.bf16.msra.mxu0 %v5500_v48  ;;  %v6271_v48 = vld [vmem:[#allocation48_spill] sm:$0xff] }
 0xefd   :  { %4014 = vmatprep.subr.bf16.mxu0 %v5503_v18  ;;  %v6272_v18 = vld [vmem:[#allocation49_spill] sm:$0xff] }
 0xf00   :  { %4016 = vmatpush1.bf16.msra.mxu0 %v5518_v4  ;;  %v6273_v4 = vld [vmem:[#allocation7_spill] sm:$0xff] }
 0xf01   :  { %4018 = vmatprep.subr.bf16.mxu0 %v5521_v0 }
 0xf04   :  { %4020 = vmatpush1.bf16.msra.mxu0 %v6264_v46 }
 0xf05   :  { %4022 = vmatprep.subr.bf16.mxu0 %v6265_v56 }
 0xf08   :  { %4024 = vmatpush1.bf16.msra.mxu0 %v6266_v44 }
 0xf09   :  { %4026 = vmatprep.subr.bf16.mxu0 %v6267_v54 }
 0xf0c   :  { %4028 = vmatpush1.bf16.msra.mxu0 %v6268_v3  ;;  %v6279_v3 = vld [vmem:[#allocation26_spill] sm:$0xff] }
 0xf0d   :  { %4030 = vmatprep.subr.bf16.mxu0 %v6269_v24  ;;  %v6274_v24 = vld [vmem:[#allocation21_spill] sm:$0xff] }
 0xf10   :  { %4032 = vmatpush1.bf16.msra.mxu0 %v6270_v61  ;;  %v6275_v61 = vld [vmem:[#allocation22_spill] sm:$0xff] }
 0xf11   :  { %4034 = vmatprep.subr.bf16.mxu0 %v6271_v48  ;;  %v6276_v48 = vld [vmem:[#allocation23_spill] sm:$0xff] }
 0xf14   :  { %4036 = vmatpush1.bf16.msra.mxu0 %v6272_v18  ;;  %v6277_v18 = vld [vmem:[#allocation24_spill] sm:$0xff] }
 0xf15   :  { %4102 = vmatprep.subr.bf16.mxu0 %v6273_v4  ;;  %v6278_v4 = vld [vmem:[#allocation25_spill] sm:$0xff] }
 0xfca   :  { %v1955_v0 = vpop.f32.mrb[38].mxu0 }
 0xfcb   :  { %v1956_v46 = vadd.f32 %v1955_v0, %v5785_v30  ;;  %v1957_v56 = vpop.f32.mrb[39].mxu0  ;;  %v6280_v0 = vld [vmem:[#allocation27_spill] sm:$0xff] }
 0xfcc   :  { %v1958_v44 = vadd.f32 %v1957_v56, %v5788_v6  ;;  %v6281_v56 = vld [vmem:[#allocation28_spill] sm:$0xff] }
 0xfcd   :  { %v1960_v54 = vmax.f32 %v1956_v46, 0.0  ;;  %v6284_v46 = vld [vmem:[#allocation32_spill] sm:$0xff] }
 0xfce   :  { %v1961_v29 = vmax.f32 %v1958_v44, 0.0  ;;  %v6285_v44 = vld [vmem:[#allocation33_spill] sm:$0xff] }
 0xfd0   :  { %2026 = vmatprep.mubr.f32.mxu1 %v1961_v29  ;;  %v6282_v29 = vld [vmem:[#allocation30_spill] sm:$0xff] }
 0xfd1   :  { %2027 = vmatmul.mubr.f32.vlgmr.msra.gmra.mrb[46].mxu1 %v1960_v54  ;;  %v5898_v54 = vpop.permute.xlu0 %1263 }
 0xfd2   :  { %2098 = vmatprep.mubr.f32.mxu1 %v4317_v50  ;;  %3976 = vmatpush3.bf16.msra.mxu1 %v6274_v24  ;;  %v6283_v50 = vld [vmem:[#allocation31_spill] sm:$0xff]  ;;  %vm1743_vm1 = vcmp.eq.s32.totalorder %v5898_v54, 0  ;;  %vm2032_vm2 = vcmp.eq.s32.totalorder %v5898_v54, 1  ;;  %vm2321_vm3 = vcmp.eq.s32.totalorder %v5898_v54, 2  ;;  %vm2610_vm4 = vcmp.eq.s32.totalorder %v5898_v54, 3 }
 0xfd3   :  { %3978 = vmatprep.subr.bf16.mxu1 %v6275_v61 }
 0xfd6   :  { %3980 = vmatpush3.bf16.msra.mxu1 %v6276_v48 }
 0xfd7   :  { %3982 = vmatprep.subr.bf16.mxu1 %v6277_v18 }
 0xfda   :  { %3984 = vmatpush3.bf16.msra.mxu1 %v6278_v4 }
 0xfdb   :  { %3986 = vmatprep.subr.bf16.mxu1 %v6279_v3 }
 0xfde   :  { %3988 = vmatpush3.bf16.msra.mxu1 %v6280_v0 }
 0xfdf   :  { %3990 = vmatprep.subr.bf16.mxu1 %v6281_v56 }
 0xfe2   :  { %3992 = vmatpush3.bf16.msra.mxu1 %v6246_v16 }
 0xfe3   :  { %3994 = vmatprep.subr.bf16.mxu1 %v6282_v29 }
 0xfe6   :  { %3996 = vmatpush3.bf16.msra.mxu1 %v6283_v50 }
 0xfe7   :  { %3998 = vmatprep.subr.bf16.mxu1 %v6284_v46  ;;  %v1744_v46 = vsel %vm1743_vm1, %v5809_v49, 0.0  ;;  %v6286_v49 = vld [vmem:[#allocation2_spill] sm:$0xff] }
 0xfea   :  { %4000 = vmatpush3.bf16.msra.mxu1 %v6285_v44 }
 0xfeb   :  { %4002 = vmatprep.subr.bf16.mxu1 %v6251_v62 }
 0xfee   :  { %4004 = vmatpush3.bf16.msra.mxu1 %v6252_v40 }
 0xfef   :  { %4038 = vmatprep.subr.bf16.mxu1 %v6253_v5 }
0x10a4   :  { %v2962_v0 = vpop.f32.mrb[46].mxu1 }
0x10a5   :  { %v2963_v56 = vpop.f32.mrb[47].mxu1 }
0x10a6   :  { %v2964_v16 = vadd.f32 %v2963_v56, %v2962_v0 }
0x10a8   :  { %v2029_v50 = vadd.f32 %v2964_v16, %v6254_v41  ;;  %v6287_v41 = vld [vmem:[#allocation3_spill] sm:$0xff] }
0x10aa   :  { %v5904_v44 = vsel %vm2032_vm2, %v2029_v50, %v1744_v46  ;;  %2099 = vmatmul.mubr.f32.vlgmr.msra.gmra.mrb[48].mxu1 %v2029_v50 }
0x10ab   :  { %4040 = vmatpush1.bf16.msra.mxu1 %v6255_v8 }
0x10ac   :  { %4042 = vmatprep.subr.bf16.mxu1 %v6256_v58 }
0x10af   :  { %4044 = vmatpush1.bf16.msra.mxu1 %v6257_v37 }
0x10b0   :  { %4046 = vmatprep.subr.bf16.mxu1 %v6258_v10 }
0x10b3   :  { %4048 = vmatpush1.bf16.msra.mxu1 %v5671_v52 }
0x10b4   :  { %4050 = vmatprep.subr.bf16.mxu1 %v5674_v47 }
0x10b7   :  { %4052 = vmatpush1.bf16.msra.mxu1 %v5689_v13 }
0x10b8   :  { %4054 = vmatprep.subr.bf16.mxu1 %v5692_v31 }
0x10bb   :  { %4056 = vmatpush1.bf16.msra.mxu1 %v5701_v32 }
0x10bc   :  { %4058 = vmatprep.subr.bf16.mxu1 %v4889_v7 }
0x10bf   :  { %4060 = vmatpush1.bf16.msra.mxu1 %v4909_v19 }
0x10c0   :  { %4062 = vmatprep.subr.bf16.mxu1 %v4912_v23 }
0x10c3   :  { %4064 = vmatpush1.bf16.msra.mxu1 %v4930_v1 }
0x10c4   :  { %4066 = vmatprep.subr.bf16.mxu1 %v4934_v22 }
0x10c7   :  { %4068 = vmatpush1.bf16.msra.mxu1 %v4951_v38 }
0x10c8   :  { %4070 = vmatprep.subr.bf16.mxu1 %v4954_v42 }
0x10cb   :  { %4072 = vmatpush1.bf16.msra.mxu1 %v4972_v53 }
0x10cc   :  { %4074 = vmatprep.subr.bf16.mxu1 %v4976_v55 }
0x10cf   :  { %4076 = vmatpush1.bf16.msra.mxu1 %v4993_v11 }
0x10d0   :  { %4078 = vmatprep.subr.bf16.mxu1 %v4998_v17 }
0x10d3   :  { %4080 = vmatpush1.bf16.msra.mxu1 %v5016_v21 }
0x10d4   :  { %4082 = vmatprep.subr.bf16.mxu1 %v5020_v27 }
0x10d7   :  { %4084 = vmatpush1.bf16.msra.mxu1 %v5035_v43 }
0x10d8   :  { %4086 = vmatprep.subr.bf16.mxu1 %v6286_v49 }
0x10db   :  { %4088 = vmatpush1.bf16.msra.mxu1 %v6287_v41 }
0x10dc   :  { %4090 = vmatprep.subr.bf16.mxu1 %v5056_v51 }
0x10df   :  { %4092 = vmatpush1.bf16.msra.mxu1 %v5071_v59 }
0x10e0   :  { %4094 = vmatprep.subr.bf16.mxu1 %v5074_v60 }
0x10e3   :  { %4096 = vmatpush1.bf16.msra.mxu1 %v5089_v14  ;;  %v6288_v14 = vld [vmem:[#allocation8_spill] sm:$0xff] }
0x10e4   :  { %4098 = vmatprep.subr.bf16.mxu1 %v5092_v20  ;;  %v6289_v20 = vld [vmem:[#allocation9_spill] sm:$0xff] }
0x10e7   :  { %4100 = vmatpush1.bf16.msra.mxu1 %v5101_v26  ;;  %v6290_v26 = vld [vmem:[#allocation10_spill] sm:$0xff] }
0x10e8   :  { %4166 = vmatprep.subr.bf16.mxu1 %v5471_v12  ;;  %v6291_v12 = vld [vmem:[#allocation11_spill] sm:$0xff] }
0x117d   :  { %v2997_v16 = vpop.f32.mrb[48].mxu1 }
0x117e   :  { %v2998_v0 = vpop.f32.mrb[49].mxu1 }
0x117f   :  { %v2999_v56 = vadd.f32 %v2998_v0, %v2997_v16  ;;  %v6292_v16 = vld [vmem:[#allocation12_spill] sm:$0xff]  ;;  %v6293_v0 = vld [vmem:[#allocation13_spill] sm:$0xff] }
0x1181   :  { %v2101_v50 = vadd.f32 %v5731_v36, %v2999_v56  ;;  %v6294_v56 = vld [vmem:[#allocation14_spill] sm:$0xff] }
0x1183   :  { %4318 = vtanh.f32 %v2101_v50 }
0x118d   :  { %v4319_v46 = vpop.eup %4318 }
0x118e   :  { %2170 = vmatmul.mubr.f32.vlgmr.msra.gmra.mrb[40].mxu0 %v4319_v46 }
0x118f   :  { %4104 = vmatpush3.bf16.msra.mxu0 %v5128_v9 }
0x1190   :  { %4106 = vmatprep.subr.bf16.mxu0 %v5130_v15 }
0x1193   :  { %4108 = vmatpush3.bf16.msra.mxu0 %v5146_v28 }
0x1194   :  { %4110 = vmatprep.subr.bf16.mxu0 %v6288_v14 }
0x1197   :  { %4112 = vmatpush3.bf16.msra.mxu0 %v6289_v20 }
0x1198   :  { %4114 = vmatprep.subr.bf16.mxu0 %v6290_v26 }
0x119b   :  { %4116 = vmatpush3.bf16.msra.mxu0 %v6291_v12 }
0x119c   :  { %4118 = vmatprep.subr.bf16.mxu0 %v6292_v16 }
0x119f   :  { %4120 = vmatpush3.bf16.msra.mxu0 %v6293_v0 }
0x11a0   :  { %4122 = vmatprep.subr.bf16.mxu0 %v6294_v56 }
0x11a3   :  { %4124 = vmatpush3.bf16.msra.mxu0 %v6259_v45 }
0x11a4   :  { %4126 = vmatprep.subr.bf16.mxu0 %v6260_v25  ;;  %v6295_v25 = vmov 0.0  }
0x11a7   :  { %4128 = vmatpush3.bf16.msra.mxu0 %v6261_v57  ;;  %v6296_v57 = vld [vmem:[#allocation36_spill] sm:$0xff] }
0x11a8   :  { %4130 = vmatprep.subr.bf16.mxu0 %v6262_v34  ;;  %v6297_v34 = vld [vmem:[#allocation37_spill] sm:$0xff] }
0x11ab   :  { %4132 = vmatpush3.bf16.msra.mxu0 %v6263_v2  ;;  %v6298_v2 = vld [vmem:[#allocation38_spill] sm:$0xff] }
0x11ac   :  { %4134 = vmatprep.subr.bf16.mxu0 %v5322_v33  ;;  %v6299_v33 = vld [vmem:[#allocation39_spill] sm:$0xff] }
0x1261   :  { %v2171_v50 = vpop.f32.mrb[40].mxu0 }
0x1262   :  { %v2172_v12 = vadd.f32 %v2171_v50, %v5754_v39  ;;  %v2173_v16 = vpop.f32.mrb[41].mxu0  ;;  %v6300_v50 = vld [vmem:[#allocation40_spill] sm:$0xff]  ;;  %v6301_v39 = vld [vmem:[#allocation41_spill] sm:$0xff] }
0x1263   :  { %v2174_v0 = vadd.f32 %v2173_v16, %v5757_v63  ;;  %v6302_v16 = vld [vmem:[#allocation42_spill] sm:$0xff] }
0x1264   :  { %v2176_v56 = vmax.f32 %v2172_v12, 0.0  ;;  %v6304_v12 = vld [vmem:[#allocation44_spill] sm:$0xff] }
0x1265   :  { %v2177_v26 = vmax.f32 %v2174_v0, 0.0  ;;  %v6310_v0 = vld [vmem:[#allocation7_spill] sm:$0xff] }
0x1267   :  { %2242 = vmatprep.mubr.f32.mxu1 %v2177_v26  ;;  %v6303_v26 = vld [vmem:[#allocation43_spill] sm:$0xff] }
0x1268   :  { %2243 = vmatmul.mubr.f32.vlgmr.msra.gmra.mrb[50].mxu1 %v2176_v56 }
0x1269   :  { %4168 = vmatpush1.bf16.msra.mxu1 %v5482_v35  ;;  %2458 = vmatprep.mubr.f32.mxu1 %v6295_v25  ;;  %v6305_v35 = vld [vmem:[#allocation45_spill] sm:$0xff]  ;;  %v6306_v25 = vld [vmem:[#allocation46_spill] sm:$0xff] }
0x126a   :  { %4170 = vmatprep.subr.bf16.mxu1 %v6296_v57  ;;  %v6307_v57 = vld [vmem:[#allocation47_spill] sm:$0xff] }
0x126d   :  { %4172 = vmatpush1.bf16.msra.mxu1 %v6297_v34  ;;  %v6308_v34 = vld [vmem:[#allocation48_spill] sm:$0xff] }
0x126e   :  { %4174 = vmatprep.subr.bf16.mxu1 %v6298_v2  ;;  %v6309_v2 = vld [vmem:[#allocation49_spill] sm:$0xff] }
0x1271   :  { %4176 = vmatpush1.bf16.msra.mxu1 %v6299_v33 }
0x1272   :  { %4178 = vmatprep.subr.bf16.mxu1 %v6300_v50 }
0x1275   :  { %4180 = vmatpush1.bf16.msra.mxu1 %v6301_v39 }
0x1276   :  { %4182 = vmatprep.subr.bf16.mxu1 %v6302_v16 }
0x1279   :  { %4184 = vmatpush1.bf16.msra.mxu1 %v6303_v26 }
0x127a   :  { %4186 = vmatprep.subr.bf16.mxu1 %v6304_v12  ;;  %v6311_v12 = vld [vmem:[#allocation27_spill] sm:$0xff] }
0x127d   :  { %4188 = vmatpush1.bf16.msra.mxu1 %v6305_v35  ;;  %v6312_v35 = vld [vmem:[#allocation28_spill] sm:$0xff] }
0x127e   :  { %4190 = vmatprep.subr.bf16.mxu1 %v6306_v25  ;;  %v6313_v25 = vld [vmem:[#allocation29_spill] sm:$0xff] }
0x1281   :  { %4192 = vmatpush1.bf16.msra.mxu1 %v6307_v57 }
0x1282   :  { %4194 = vmatprep.subr.bf16.mxu1 %v6308_v34 }
0x1285   :  { %4196 = vmatpush1.bf16.msra.mxu1 %v6309_v2 }
0x1286   :  { %4262 = vmatprep.subr.bf16.mxu1 %v6310_v0 }
0x133b   :  { %v2244_v56 = vpop.f32.mrb[50].mxu1 }
0x133c   :  { %v2245_v39 = vadd.f32 %v2244_v56, %v5785_v30  ;;  %v2246_v33 = vpop.f32.mrb[51].mxu1 }
0x133d   :  { %v2247_v50 = vadd.f32 %v2246_v33, %v5788_v6 }
0x133e   :  { %v2249_v26 = vmax.f32 %v2245_v39, 0.0 }
0x133f   :  { %v2250_v16 = vmax.f32 %v2247_v50, 0.0 }
0x1341   :  { %2315 = vmatprep.mubr.f32.mxu0 %v2250_v16 }
0x1342   :  { %2316 = vmatmul.mubr.f32.vlgmr.msra.gmra.mrb[42].mxu0 %v2249_v26 }
0x1343   :  { %2387 = vmatprep.mubr.f32.mxu0 %v4319_v46  ;;  %4136 = vmatpush3.bf16.msra.mxu0 %v6274_v24  ;;  %v6314_v46 = vld [vmem:[#allocation31_spill] sm:$0xff]  ;;  %v6315_v24 = vld [vmem:[#allocation32_spill] sm:$0xff] }
0x1344   :  { %4138 = vmatprep.subr.bf16.mxu0 %v6275_v61  ;;  %v6316_v61 = vld [vmem:[#allocation33_spill] sm:$0xff] }
0x1347   :  { %4140 = vmatpush3.bf16.msra.mxu0 %v6276_v48 }
0x1348   :  { %4142 = vmatprep.subr.bf16.mxu0 %v6277_v18 }
0x134b   :  { %4144 = vmatpush3.bf16.msra.mxu0 %v6278_v4 }
0x134c   :  { %4146 = vmatprep.subr.bf16.mxu0 %v6279_v3  ;;  %v5996_v3 = vld [vmem:[%s6067_s9] ss:$0 sm:$0xff] }
0x134f   :  { %4148 = vmatpush3.bf16.msra.mxu0 %v6311_v12 }
0x1350   :  { %4150 = vmatprep.subr.bf16.mxu0 %v6312_v35 }
0x1353   :  { %4152 = vmatpush3.bf16.msra.mxu0 %v6313_v25 }
0x1354   :  { %4154 = vmatprep.subr.bf16.mxu0 %v6282_v29 }
0x1357   :  { %4156 = vmatpush3.bf16.msra.mxu0 %v6314_v46 }
0x1358   :  { %4158 = vmatprep.subr.bf16.mxu0 %v6315_v24 }
0x135b   :  { %4160 = vmatpush3.bf16.msra.mxu0 %v6316_v61 }
0x135c   :  { %4162 = vmatprep.subr.bf16.mxu0 %v6251_v62 }
0x135f   :  { %4164 = vmatpush3.bf16.msra.mxu0 %v6252_v40 }
0x1360   :  { %4198 = vmatprep.subr.bf16.mxu0 %v6253_v5 }
0x1415   :  { %v3032_v48 = vpop.f32.mrb[42].mxu0 }
0x1416   :  { %v3033_v18 = vpop.f32.mrb[43].mxu0 }
0x1417   :  { %v3034_v4 = vadd.f32 %v3033_v18, %v3032_v48 }
0x1419   :  { %v2318_v29 = vadd.f32 %v5996_v3, %v3034_v4 }
0x141b   :  { %v6000_v57 = vsel %vm2321_vm3, %v2318_v29, %v5904_v44  ;;  %2388 = vmatmul.mubr.f32.vlgmr.msra.gmra.mrb[44].mxu0 %v2318_v29 }
0x141c   :  { %4200 = vmatpush1.bf16.msra.mxu0 %v6255_v8 }
0x141d   :  { %4202 = vmatprep.subr.bf16.mxu0 %v6256_v58 }
0x1420   :  { %4204 = vmatpush1.bf16.msra.mxu0 %v6257_v37 }
0x1421   :  { %4206 = vmatprep.subr.bf16.mxu0 %v6258_v10 }
0x1424   :  { %4208 = vmatpush1.bf16.msra.mxu0 %v5671_v52 }
0x1425   :  { %4210 = vmatprep.subr.bf16.mxu0 %v5674_v47 }
0x1428   :  { %4212 = vmatpush1.bf16.msra.mxu0 %v5689_v13 }
0x1429   :  { %4214 = vmatprep.subr.bf16.mxu0 %v5692_v31 }
0x142c   :  { %4216 = vmatpush1.bf16.msra.mxu0 %v5701_v32 }
0x142d   :  { %4218 = vmatprep.subr.bf16.mxu0 %v4889_v7  ;;  %v6317_v7 = vld [vmem:[#allocation4_spill] sm:$0xff] }
0x1430   :  { %4220 = vmatpush1.bf16.msra.mxu0 %v4909_v19  ;;  %v6318_v19 = vld [vmem:[#allocation5_spill] sm:$0xff] }
0x1431   :  { %4222 = vmatprep.subr.bf16.mxu0 %v4912_v23  ;;  %v6319_v23 = vld [vmem:[#allocation6_spill] sm:$0xff] }
0x1434   :  { %4224 = vmatpush1.bf16.msra.mxu0 %v4930_v1 }
0x1435   :  { %4226 = vmatprep.subr.bf16.mxu0 %v4934_v22 }
0x1438   :  { %4228 = vmatpush1.bf16.msra.mxu0 %v4951_v38 }
0x1439   :  { %4230 = vmatprep.subr.bf16.mxu0 %v4954_v42 }
0x143c   :  { %4232 = vmatpush1.bf16.msra.mxu0 %v4972_v53 }
0x143d   :  { %4234 = vmatprep.subr.bf16.mxu0 %v4976_v55  ;;  %v6320_v55 = vld [vmem:[#allocation10_spill] sm:$0xff] }
0x1440   :  { %4236 = vmatpush1.bf16.msra.mxu0 %v4993_v11  ;;  %v6321_v11 = vld [vmem:[#allocation11_spill] sm:$0xff] }
0x1441   :  { %4238 = vmatprep.subr.bf16.mxu0 %v4998_v17  ;;  %v6322_v17 = vld [vmem:[#allocation12_spill] sm:$0xff] }
0x1444   :  { %4240 = vmatpush1.bf16.msra.mxu0 %v5016_v21  ;;  %v6323_v21 = vld [vmem:[#allocation13_spill] sm:$0xff] }
0x1445   :  { %4242 = vmatprep.subr.bf16.mxu0 %v5020_v27  ;;  %v6324_v27 = vld [vmem:[#allocation14_spill] sm:$0xff] }
0x1448   :  { %4244 = vmatpush1.bf16.msra.mxu0 %v5035_v43  ;;  %v6325_v43 = vld [vmem:[#allocation16_spill] sm:$0xff] }
0x1449   :  { %4246 = vmatprep.subr.bf16.mxu0 %v6286_v49 }
0x144c   :  { %4248 = vmatpush1.bf16.msra.mxu0 %v6287_v41 }
0x144d   :  { %4250 = vmatprep.subr.bf16.mxu0 %v5056_v51  ;;  %v6326_v51 = vld [vmem:[#allocation17_spill] sm:$0xff] }
0x1450   :  { %4252 = vmatpush1.bf16.msra.mxu0 %v5071_v59  ;;  %v6327_v59 = vld [vmem:[#allocation18_spill] sm:$0xff] }
0x1451   :  { %4254 = vmatprep.subr.bf16.mxu0 %v5074_v60  ;;  %v6328_v60 = vld [vmem:[#allocation19_spill] sm:$0xff] }
0x1454   :  { %4256 = vmatpush1.bf16.msra.mxu0 %v6317_v7 }
0x1455   :  { %4258 = vmatprep.subr.bf16.mxu0 %v6318_v19 }
0x1458   :  { %4260 = vmatpush1.bf16.msra.mxu0 %v6319_v23 }
0x14ee   :  { %v3067_v1 = vpop.f32.mrb[44].mxu0 }
0x14ef   :  { %v3068_v22 = vpop.f32.mrb[45].mxu0 }
0x14f0   :  { %v3069_v38 = vadd.f32 %v3068_v22, %v3067_v1 }
0x14f2   :  { %v2390_v42 = vadd.f32 %v5731_v36, %v3069_v38 }
0x14f4   :  { %4320 = vtanh.f32 %v2390_v42 }
0x14fe   :  { %v4321_v53 = vpop.eup %4320 }
0x14ff   :  { %2459 = vmatmul.mubr.f32.vlgmr.msra.gmra.mrb[52].mxu1 %v4321_v53 }
0x1500   :  { %4264 = vmatpush3.bf16.msra.mxu1 %v5128_v9 }
0x1501   :  { %4266 = vmatprep.subr.bf16.mxu1 %v5130_v15 }
0x1504   :  { %4268 = vmatpush3.bf16.msra.mxu1 %v5146_v28 }
0x1505   :  { %4270 = vmatprep.subr.bf16.mxu1 %v6288_v14 }
0x1508   :  { %4272 = vmatpush3.bf16.msra.mxu1 %v6289_v20  ;;  %v6329_v20 = vld [vmem:[#allocation55_spill] sm:$0xff] }
0x1509   :  { %4274 = vmatprep.subr.bf16.mxu1 %v6320_v55 }
0x150c   :  { %4276 = vmatpush3.bf16.msra.mxu1 %v6321_v11 }
0x150d   :  { %4278 = vmatprep.subr.bf16.mxu1 %v6322_v17 }
0x1510   :  { %4280 = vmatpush3.bf16.msra.mxu1 %v6323_v21 }
0x1511   :  { %4282 = vmatprep.subr.bf16.mxu1 %v6324_v27 }
0x1514   :  { %4284 = vmatpush3.bf16.msra.mxu1 %v6259_v45 }
0x1515   :  { %4286 = vmatprep.subr.bf16.mxu1 %v6325_v43 }
0x1518   :  { %4288 = vmatpush3.bf16.msra.mxu1 %v6326_v51 }
0x1519   :  { %4290 = vmatprep.subr.bf16.mxu1 %v6327_v59 }
0x151c   :  { %4292 = vmatpush3.bf16.msra.mxu1 %v6328_v60 }
0x15d2   :  { %v2460_v14 = vpop.f32.mrb[52].mxu1 }
0x15d3   :  { %v2461_v9 = vadd.f32 %v2460_v14, %v6329_v20  ;;  %v2462_v15 = vpop.f32.mrb[53].mxu1 }
0x15d4   :  { %v2463_v28 = vadd.f32 %v2462_v15, %v5757_v63 }
0x15d5   :  { %v2465_v32 = vmax.f32 %v2461_v9, 0.0 }
0x15d6   :  { %v2466_v40 = vmax.f32 %v2463_v28, 0.0 }
0x15d8   :  { %2531 = vmatprep.mubr.f32.mxu0 %v2466_v40 }
0x15d9   :  { %2532 = vmatmul.mubr.f32.vlgmr.msra.gmra.mrb[46].mxu0 %v2465_v32 }
0x16ac   :  { %v2533_v52 = vpop.f32.mrb[46].mxu0 }
0x16ad   :  { %v2534_v47 = vadd.f32 %v2533_v52, %v5785_v30  ;;  %v2535_v13 = vpop.f32.mrb[47].mxu0 }
0x16ae   :  { %v2536_v31 = vadd.f32 %v2535_v13, %v5788_v6 }
0x16af   :  { %v2538_v62 = vmax.f32 %v2534_v47, 0.0 }
0x16b0   :  { %v2539_v36 = vmax.f32 %v2536_v31, 0.0 }
0x16b2   :  { %2604 = vmatprep.mubr.f32.mxu1 %v2539_v36 }
0x16b3   :  { %2605 = vmatmul.mubr.f32.vlgmr.msra.gmra.mrb[54].mxu1 %v2538_v62 }
0x1786   :  { %v3102_v5 = vpop.f32.mrb[54].mxu1 }
0x1787   :  { %v3103_v8 = vpop.f32.mrb[55].mxu1 }
0x1788   :  { %v3104_v58 = vadd.f32 %v3103_v8, %v3102_v5 }
0x178a   :  { %v2607_v37 = vadd.f32 %v5996_v3, %v3104_v58 }
0x178c   :  { %v2611_v63 = vsel %vm2610_vm4, %v2607_v37, %v6000_v57 }
0x178d   :  { %2612 = vst [vmem:[%s6070_s10] sm:$0xff] %v2611_v63 }

</bundles_post_ra>
